<compile_context>
chip_gen: v7x
topology: tpu7x:2x2x1
jax: 0.10.0
libtpu: 0.0.40
codegen_flags: <defaults>
</compile_context>

<pallas_src>
import functools

import jax
import jax.numpy as jnp
from jax.experimental import pallas as pl
from jax.experimental.pallas import tpu as pltpu

NEG_RATIO = 3.0
POS_MIN = 0.1

LANES = 128
ROW_ALIGN = 256           # rows padded to a multiple of this ((8,128)-aligned)
TILE_ROWS_LOSS = 2048     # 1 MiB per stream block; 7 blocks x 2 buffers ~= 14 MiB VMEM
CHUNK_ROWS = 256          # bisection chunk inside kernel 2 (128 KiB per load)
BISECT_STEPS = 32         # resolves the full non-negative f32 bit-pattern range
_HI_KEY = 0x7F800001      # just above the bit pattern of +inf

VMEM_LIMIT_LOSS = 32 * 1024 * 1024
VMEM_LIMIT_TOPK = 48 * 1024 * 1024
# Resident path only if the double-buffered (2, rows, 128) f32 stack fits
# comfortably on every generation (v7x has 64 MiB physical VMEM per TC).
RESIDENT_NEG_BYTES_MAX = 28 * 1024 * 1024


def _round_up(x, m):
    return (x + m - 1) // m * m


# ---------------------------------------------------------------------------
# Kernel 1: fused elementwise loss + positive-mask reductions (region+affinity)
# ---------------------------------------------------------------------------
def _fused_loss_kernel(gt_r_ref, pr_r_ref, gt_a_ref, pr_a_ref, conf_ref,
                       neg_ref, psum_r_ref, psum_a_ref, pcnt_r_ref, pcnt_a_ref,
                       *, pos_min):
    @pl.when(pl.program_id(0) == 0)
    def _init():
        psum_r_ref[...] = jnp.zeros_like(psum_r_ref)
        psum_a_ref[...] = jnp.zeros_like(psum_a_ref)
        pcnt_r_ref[...] = jnp.zeros_like(pcnt_r_ref)
        pcnt_a_ref[...] = jnp.zeros_like(pcnt_a_ref)

    conf = conf_ref[...].astype(jnp.float32)     # read conf once for both maps

    def one_map(gt_ref, pred_ref, slot, psum_ref, pcnt_ref):
        gt = gt_ref[...].astype(jnp.float32)
        diff = gt - pred_ref[...].astype(jnp.float32)
        loss = diff * diff * conf
        pos = gt > pos_min
        psum_ref[...] += jnp.sum(jnp.where(pos, loss, 0.0),
                                 axis=0, keepdims=True)
        pcnt_ref[...] += jnp.sum(pos.astype(jnp.int32),
                                 axis=0, keepdims=True)
        neg_ref[slot] = jnp.where(pos, 0.0, loss)

    one_map(gt_r_ref, pr_r_ref, 0, psum_r_ref, pcnt_r_ref)
    one_map(gt_a_ref, pr_a_ref, 1, psum_a_ref, pcnt_a_ref)


def _fused_loss_call(gt_r2, pr_r2, gt_a2, pr_a2, conf2, tr, pos_min):
    rows = gt_r2.shape[0]
    nt = rows // tr
    tile = pl.BlockSpec((tr, LANES), lambda i: (i, 0))
    lane = pl.BlockSpec((1, LANES), lambda i: (0, 0))
    kern = functools.partial(_fused_loss_kernel, pos_min=pos_min)
    return pl.pallas_call(
        kern,
        grid=(nt,),
        in_specs=[tile, tile, tile, tile, tile],
        out_specs=(
            pl.BlockSpec((2, tr, LANES), lambda i: (0, i, 0)),  # stacked neg losses
            lane, lane, lane, lane),
        out_shape=(
            jax.ShapeDtypeStruct((2, rows, LANES), jnp.float32),  # neg (region, affinity)
            jax.ShapeDtypeStruct((1, LANES), jnp.float32),        # pos-loss lanes (region)
            jax.ShapeDtypeStruct((1, LANES), jnp.float32),        # pos-loss lanes (affinity)
            jax.ShapeDtypeStruct((1, LANES), jnp.int32),          # pos-count lanes (region)
            jax.ShapeDtypeStruct((1, LANES), jnp.int32),          # pos-count lanes (affinity)
        ),
        compiler_params=pltpu.CompilerParams(
            dimension_semantics=("arbitrary",),
            vmem_limit_bytes=VMEM_LIMIT_LOSS),
    )(gt_r2, pr_r2, gt_a2, pr_a2, conf2)


# ---------------------------------------------------------------------------
# Kernel 2: VMEM-resident top-k stats via bit-pattern bisection (both maps)
# ---------------------------------------------------------------------------
def _topk_kernel(k_ref, neg_ref, sum_ref, cnt_ref, key_ref,
                 *, n_chunks, chunk_rows, steps):
    m = pl.program_id(0)            # which map (0=region, 1=affinity)
    k = k_ref[m]

    def lane_count_ge(mid):
        def body(c, acc):
            r0 = pl.multiple_of(c * chunk_rows, chunk_rows)
            keys = pltpu.bitcast(neg_ref[pl.ds(r0, chunk_rows), :], jnp.int32)
            return acc + jnp.sum((keys >= mid).astype(jnp.int32),
                                 axis=0, keepdims=True)
        return jax.lax.fori_loop(0, n_chunks, body,
                                 jnp.zeros((1, LANES), jnp.int32))

    def bisect_step(_, carry):
        lo, hi = carry
        mid = lo + ((hi - lo) >> 1)
        go_up = jnp.sum(lane_count_ge(mid)) >= k
        return (jnp.where(go_up, mid, lo), jnp.where(go_up, hi, mid))

    lo, _ = jax.lax.fori_loop(0, steps, bisect_step,
                              (jnp.int32(0), jnp.int32(_HI_KEY)))

    def final_body(c, carry):
        s_acc, c_acc = carry
        r0 = pl.multiple_of(c * chunk_rows, chunk_rows)
        vals = neg_ref[pl.ds(r0, chunk_rows), :]
        keys = pltpu.bitcast(vals, jnp.int32)
        gtm = keys > lo
        s_acc = s_acc + jnp.sum(jnp.where(gtm, vals, 0.0),
                                axis=0, keepdims=True)
        c_acc = c_acc + jnp.sum(gtm.astype(jnp.int32),
                                axis=0, keepdims=True)
        return s_acc, c_acc

    s_acc, c_acc = jax.lax.fori_loop(
        0, n_chunks, final_body,
        (jnp.zeros((1, LANES), jnp.float32), jnp.zeros((1, LANES), jnp.int32)))

    sum_ref[...] = s_acc                                  # per-lane sum of x > thr
    cnt_ref[...] = c_acc                                  # per-lane count of x > thr
    key_ref[...] = jnp.zeros((1, LANES), jnp.int32) + lo  # bit pattern of k-th largest


def _topk_stats_call(k_arr, neg):
    _, rows, _ = neg.shape
    n_chunks = rows // CHUNK_ROWS
    kern = functools.partial(_topk_kernel, n_chunks=n_chunks,
                             chunk_rows=CHUNK_ROWS, steps=BISECT_STEPS)
    lane_out = pl.BlockSpec((None, 1, LANES), lambda m, k: (m, 0, 0))
    return pl.pallas_call(
        kern,
        out_shape=(
            jax.ShapeDtypeStruct((2, 1, LANES), jnp.float32),  # sum of x > thr
            jax.ShapeDtypeStruct((2, 1, LANES), jnp.int32),    # count of x > thr
            jax.ShapeDtypeStruct((2, 1, LANES), jnp.int32),    # key of k-th largest
        ),
        grid_spec=pltpu.PrefetchScalarGridSpec(
            num_scalar_prefetch=1,
            grid=(2,),
            in_specs=[pl.BlockSpec((None, rows, LANES), lambda m, k: (m, 0, 0))],
            out_specs=(lane_out, lane_out, lane_out),
        ),
        compiler_params=pltpu.CompilerParams(
            dimension_semantics=("parallel",),      # 2 TCs on v7x, serial elsewhere
            vmem_limit_bytes=VMEM_LIMIT_TOPK),
    )(k_arr, neg)


# ---------------------------------------------------------------------------
# Wrapper: Loss_OHEM forward
# ---------------------------------------------------------------------------
def _pack_inputs(arrs):
    n = arrs[0].size
    rows_raw = pl.cdiv(n, LANES)
    tr = min(TILE_ROWS_LOSS, _round_up(rows_raw, ROW_ALIGN))
    rows = _round_up(rows_raw, tr)
    total = rows * LANES
    out = []
    for a in arrs:
        flat = jnp.ravel(a)
        flat = jnp.pad(flat, (0, total - n))      # zero padding: semantics-preserving
        out.append(flat.reshape(rows, LANES))
    return out, rows, tr


@functools.partial(jax.jit, static_argnames=("neg_ratio", "pos_min"))
def loss_ohem_forward(gt_region, pred_region, gt_affinity, pred_affinity,
                      conf_map, neg_ratio=NEG_RATIO, pos_min=POS_MIN):
    n_elems = gt_region.size
    (gt_r2, pr_r2, gt_a2, pr_a2, conf2), rows, tr = _pack_inputs(
        [gt_region, pred_region, gt_affinity, pred_affinity, conf_map])

    neg, psum_r, psum_a, pcnt_r, pcnt_a = _fused_loss_call(
        gt_r2, pr_r2, gt_a2, pr_a2, conf2, tr, pos_min)

    pos_sum = jnp.stack([jnp.sum(psum_r), jnp.sum(psum_a)])                 # (2,)
    pos_num = jnp.stack([jnp.sum(pcnt_r), jnp.sum(pcnt_a)]).astype(jnp.float32)
    neg_num = jnp.minimum(jnp.float32(n_elems) - pos_num, neg_ratio * pos_num)
    k = neg_num.astype(jnp.int32)                                           # (2,)

    neg_bytes = 2 * rows * LANES * 4          # double-buffered footprint in kernel 2
    if neg_bytes <= RESIDENT_NEG_BYTES_MAX:
        s_l, c_l, key_l = _topk_stats_call(k, neg)
        sum_gt = jnp.sum(s_l, axis=(1, 2))                                  # (2,)
        cnt_gt = jnp.sum(c_l, axis=(1, 2))                                  # (2,)
        thr = jax.lax.bitcast_convert_type(key_l[:, 0, 0], jnp.float32)     # (2,)
        extra = jnp.where(k > cnt_gt,
                          (k - cnt_gt).astype(jnp.float32) * thr, 0.0)
        topk_sum = sum_gt + extra
    else:
        # TODO(synk): streaming Pallas bisection for maps too large to keep
        # VMEM-resident; plain-JAX sort fallback keeps correctness meanwhile.
        flat = neg.reshape(2, -1)
        srt = jnp.sort(flat, axis=1)[:, ::-1]
        idx = jnp.arange(flat.shape[1])[None, :]
        topk_sum = jnp.sum(jnp.where(idx < k[:, None], srt, 0.0), axis=1)

    loss = (topk_sum + pos_sum) / (neg_num + pos_num)
    return loss[0] + loss[1], loss[0], loss[1]


# ---------------------------------------------------------------------------
# Pure-JAX reference (mirrors the PyTorch code exactly) for a sanity check.
# ---------------------------------------------------------------------------
def _ref_get_loss(gt, pred, conf, neg_ratio, pos_min):
    n = gt.size
    pos = (gt > pos_min).astype(jnp.float32).reshape(-1)
    pos_num = pos.sum()
    neg_num = jnp.minimum(jnp.float32(n) - pos_num, neg_ratio * pos_num)
    loss = ((gt - pred) ** 2 * conf).reshape(-1)
    pos_loss = (loss * pos).sum()
    neg_loss = loss * (1.0 - pos)
    k = neg_num.astype(jnp.int32)
    sorted_neg = jnp.sort(neg_loss)[::-1]
    topk = jnp.where(jnp.arange(n) < k, sorted_neg, 0.0).sum()
    return (topk + pos_loss) / (neg_num + pos_num)


if __name__ == "__main__":
    key = jax.random.PRNGKey(0)
    k1, k2, k3, k4, k5 = jax.random.split(key, 5)

    b, c, h, w = 2, 1, 16, 16          # N = 512 elements per map
    shape = (b, c, h, w)
    gt_region = jax.random.uniform(k1, shape, dtype=jnp.float32)
    pred_region = jax.random.uniform(k2, shape, dtype=jnp.float32)
    gt_affinity = jax.random.uniform(k3, shape, dtype=jnp.float32)
    pred_affinity = jax.random.uniform(k4, shape, dtype=jnp.float32)
    conf_map = jax.random.uniform(k5, shape, dtype=jnp.float32)

    total, region_loss, affinity_loss = loss_ohem_forward(
        gt_region, pred_region, gt_affinity, pred_affinity, conf_map)
    total = jax.block_until_ready(total)

    # sanity check against the pure-JAX mirror of the PyTorch math
    ref_total = (_ref_get_loss(gt_region, pred_region, conf_map, NEG_RATIO, POS_MIN)
                 + _ref_get_loss(gt_affinity, pred_affinity, conf_map, NEG_RATIO, POS_MIN))
    assert jnp.allclose(total, ref_total, rtol=1e-4, atol=1e-6), \
        (float(total), float(ref_total))

    print('region loss is {}, affinity loss is {}'.format(
        float(region_loss), float(affinity_loss)))
    print("KERNEL_OK")
</pallas_src>

<mosaic_0001>
module attributes {stable_mosaic.version = 11 : i64} {
  func.func @_topk_kernel(%arg0: i32, %arg1: memref<2xi32, #tpu.memory_space<smem>>, %arg2: memref<1x256x128xf32, #tpu.memory_space<vmem>>, %arg3: memref<1x1x128xf32, #tpu.memory_space<vmem>>, %arg4: memref<1x1x128xi32, #tpu.memory_space<vmem>>, %arg5: memref<1x1x128xi32, #tpu.memory_space<vmem>>) attributes {dimension_semantics = [#tpu.dimension_semantics<parallel>], iteration_bounds = array<i64: 2>, scalar_prefetch = 1 : i64, scratch_operands = 0 : i64, tpu.core_type = #tpu.core_type<tc>, window_params = [{transform_indices = @transform_0, window_bounds = array<i64: 1, 256, 128>}, {transform_indices = @transform_1, window_bounds = array<i64: 1, 1, 128>}, {transform_indices = @transform_2, window_bounds = array<i64: 1, 1, 128>}, {transform_indices = @transform_3, window_bounds = array<i64: 1, 1, 128>}]} {
    %0 = arith.index_cast %arg0 : i32 to index
    %1 = memref.load %arg1[%0] : memref<2xi32, #tpu.memory_space<smem>>
    %c0_i32 = arith.constant 0 : i32
    %c2139095041_i32 = arith.constant 2139095041 : i32
    %c0_i32_0 = arith.constant 0 : i32
    %c32_i32 = arith.constant 32 : i32
    %2 = arith.addi %c0_i32_0, %c32_i32 : i32
    %c1_i32 = arith.constant 1 : i32
    %3:2 = scf.for %arg6 = %c0_i32_0 to %2 step %c1_i32 iter_args(%arg7 = %c0_i32, %arg8 = %c2139095041_i32) -> (i32, i32)  : i32 {
      %35 = arith.subi %arg8, %arg7 : i32
      %c1_i32_18 = arith.constant 1 : i32
      %36 = arith.shrsi %35, %c1_i32_18 : i32
      %37 = arith.addi %arg7, %36 : i32
      %c0_i32_19 = arith.constant 0 : i32
      %38 = vector.broadcast %c0_i32_19 : i32 to vector<1x128xi32>
      %c0_i32_20 = arith.constant 0 : i32
      %c256_i32_21 = arith.constant 256 : i32
      %39 = arith.muli %c0_i32_20, %c256_i32_21 : i32
      %40 = tpu.assume_multiple %39, 256 : i32
      %c0_22 = arith.constant 0 : index
      %41 = arith.index_cast %40 : i32 to index
      %c0_23 = arith.constant 0 : index
      %42 = vector.load %arg2[%c0_22, %41, %c0_23] : memref<1x256x128xf32, #tpu.memory_space<vmem>>, vector<1x256x128xf32>
      %43 = vector.shape_cast %42 : vector<1x256x128xf32> to vector<256x128xf32>
      %44 = tpu.bitcast %43 : vector<256x128xf32> -> vector<256x128xi32>
      %45 = vector.broadcast %37 : i32 to vector<256x128xi32>
      %46 = arith.cmpi sge, %44, %45 : vector<256x128xi32>
      %47 = arith.extui %46 : vector<256x128xi1> to vector<256x128xi32>
      %cst_24 = arith.constant dense<0> : vector<128xi32>
      %48 = vector.multi_reduction <add>, %47, %cst_24 [0] : vector<256x128xi32> to vector<128xi32>
      %49 = vector.shape_cast %48 : vector<128xi32> to vector<1x128xi32>
      %50 = arith.addi %38, %49 : vector<1x128xi32>
      %c1_i32_25 = arith.constant 1 : i32
      %51 = vector.shape_cast %50 : vector<1x128xi32> to vector<1x1x128xi32>
      %cst_26 = arith.constant dense<0> : vector<1xi32>
      %52 = vector.multi_reduction <add>, %51, %cst_26 [1, 2] : vector<1x1x128xi32> to vector<1xi32>
      %53 = vector.shape_cast %52 : vector<1xi32> to vector<1x1x1xi32>
      %54 = vector.extract %53[0, 0, 0] : i32 from vector<1x1x1xi32>
      %55 = arith.cmpi sge, %54, %1 : i32
      %56 = arith.select %55, %37, %arg7 : i32
      %57 = arith.select %55, %arg8, %37 : i32
      scf.yield %56, %57 : i32, i32
    }
    %cst = arith.constant 0.000000e+00 : f32
    %4 = vector.broadcast %cst : f32 to vector<1x128xf32>
    %c0_i32_1 = arith.constant 0 : i32
    %5 = vector.broadcast %c0_i32_1 : i32 to vector<1x128xi32>
    %c0_i32_2 = arith.constant 0 : i32
    %c256_i32 = arith.constant 256 : i32
    %6 = arith.muli %c0_i32_2, %c256_i32 : i32
    %7 = tpu.assume_multiple %6, 256 : i32
    %c0 = arith.constant 0 : index
    %8 = arith.index_cast %7 : i32 to index
    %c0_3 = arith.constant 0 : index
    %9 = vector.load %arg2[%c0, %8, %c0_3] : memref<1x256x128xf32, #tpu.memory_space<vmem>>, vector<1x256x128xf32>
    %10 = vector.shape_cast %9 : vector<1x256x128xf32> to vector<256x128xf32>
    %11 = tpu.bitcast %10 : vector<256x128xf32> -> vector<256x128xi32>
    %12 = vector.broadcast %3#0 : i32 to vector<256x128xi32>
    %13 = arith.cmpi sgt, %11, %12 : vector<256x128xi32>
    %cst_4 = arith.constant 0.000000e+00 : f32
    %14 = vector.broadcast %cst_4 : f32 to vector<256x128xf32>
    %15 = arith.select %13, %10, %14 : vector<256x128xi1>, vector<256x128xf32>
    %cst_5 = arith.constant dense<0.000000e+00> : vector<128xf32>
    %16 = vector.multi_reduction <add>, %15, %cst_5 [0] : vector<256x128xf32> to vector<128xf32>
    %17 = vector.shape_cast %16 : vector<128xf32> to vector<1x128xf32>
    %18 = arith.addf %4, %17 : vector<1x128xf32>
    %19 = arith.extui %13 : vector<256x128xi1> to vector<256x128xi32>
    %cst_6 = arith.constant dense<0> : vector<128xi32>
    %20 = vector.multi_reduction <add>, %19, %cst_6 [0] : vector<256x128xi32> to vector<128xi32>
    %21 = vector.shape_cast %20 : vector<128xi32> to vector<1x128xi32>
    %22 = arith.addi %5, %21 : vector<1x128xi32>
    %c1_i32_7 = arith.constant 1 : i32
    %c0_8 = arith.constant 0 : index
    %c0_9 = arith.constant 0 : index
    %c0_10 = arith.constant 0 : index
    %23 = vector.load %arg3[%c0_8, %c0_9, %c0_10] : memref<1x1x128xf32, #tpu.memory_space<vmem>>, vector<1x1x128xf32>
    %24 = vector.shape_cast %23 : vector<1x1x128xf32> to vector<1x128xf32>
    %25 = vector.shape_cast %18 : vector<1x128xf32> to vector<1x1x128xf32>
    tpu.vector_store %arg3[%c0_8, %c0_9, %c0_10], %25 {strides = array<i32>} : memref<1x1x128xf32, #tpu.memory_space<vmem>>, vector<1x1x128xf32>,
    %c0_11 = arith.constant 0 : index
    %c0_12 = arith.constant 0 : index
    %c0_13 = arith.constant 0 : index
    %26 = vector.load %arg4[%c0_11, %c0_12, %c0_13] : memref<1x1x128xi32, #tpu.memory_space<vmem>>, vector<1x1x128xi32>
    %27 = vector.shape_cast %26 : vector<1x1x128xi32> to vector<1x128xi32>
    %28 = vector.shape_cast %22 : vector<1x128xi32> to vector<1x1x128xi32>
    tpu.vector_store %arg4[%c0_11, %c0_12, %c0_13], %28 {strides = array<i32>} : memref<1x1x128xi32, #tpu.memory_space<vmem>>, vector<1x1x128xi32>,
    %c0_i32_14 = arith.constant 0 : i32
    %29 = vector.broadcast %c0_i32_14 : i32 to vector<1x128xi32>
    %30 = vector.broadcast %3#0 : i32 to vector<1x128xi32>
    %31 = arith.addi %29, %30 : vector<1x128xi32>
    %c0_15 = arith.constant 0 : index
    %c0_16 = arith.constant 0 : index
    %c0_17 = arith.constant 0 : index
    %32 = vector.load %arg5[%c0_15, %c0_16, %c0_17] : memref<1x1x128xi32, #tpu.memory_space<vmem>>, vector<1x1x128xi32>
    %33 = vector.shape_cast %32 : vector<1x1x128xi32> to vector<1x128xi32>
    %34 = vector.shape_cast %31 : vector<1x128xi32> to vector<1x1x128xi32>
    tpu.vector_store %arg5[%c0_15, %c0_16, %c0_17], %34 {strides = array<i32>} : memref<1x1x128xi32, #tpu.memory_space<vmem>>, vector<1x1x128xi32>,
    return
  }
  func.func @transform_0(%arg0: i32, %arg1: memref<2xi32, #tpu.memory_space<smem>>) -> (i32, i32, i32) {
    %c0_i32 = arith.constant 0 : i32
    %c0_i32_0 = arith.constant 0 : i32
    %c0_i32_1 = arith.constant 0 : i32
    return %arg0, %c0_i32, %c0_i32_0 : i32, i32, i32
  }
  func.func @transform_1(%arg0: i32, %arg1: memref<2xi32, #tpu.memory_space<smem>>) -> (i32, i32, i32) {
    %c0_i32 = arith.constant 0 : i32
    %c0_i32_0 = arith.constant 0 : i32
    %c0_i32_1 = arith.constant 0 : i32
    return %arg0, %c0_i32, %c0_i32_0 : i32, i32, i32
  }
  func.func @transform_2(%arg0: i32, %arg1: memref<2xi32, #tpu.memory_space<smem>>) -> (i32, i32, i32) {
    %c0_i32 = arith.constant 0 : i32
    %c0_i32_0 = arith.constant 0 : i32
    %c0_i32_1 = arith.constant 0 : i32
    return %arg0, %c0_i32, %c0_i32_0 : i32, i32, i32
  }
  func.func @transform_3(%arg0: i32, %arg1: memref<2xi32, #tpu.memory_space<smem>>) -> (i32, i32, i32) {
    %c0_i32 = arith.constant 0 : i32
    %c0_i32_0 = arith.constant 0 : i32
    %c0_i32_1 = arith.constant 0 : i32
    return %arg0, %c0_i32, %c0_i32_0 : i32, i32, i32
  }
}

module attributes {stable_mosaic.version = 11 : i64} {
  func.func @_fused_loss_kernel(%arg0: i32, %arg1: memref<256x128xf32, #tpu.memory_space<vmem>>, %arg2: memref<256x128xf32, #tpu.memory_space<vmem>>, %arg3: memref<256x128xf32, #tpu.memory_space<vmem>>, %arg4: memref<256x128xf32, #tpu.memory_space<vmem>>, %arg5: memref<256x128xf32, #tpu.memory_space<vmem>>, %arg6: memref<2x256x128xf32, #tpu.memory_space<vmem>>, %arg7: memref<1x128xf32, #tpu.memory_space<vmem>>, %arg8: memref<1x128xf32, #tpu.memory_space<vmem>>, %arg9: memref<1x128xi32, #tpu.memory_space<vmem>>, %arg10: memref<1x128xi32, #tpu.memory_space<vmem>>) attributes {dimension_semantics = [#tpu.dimension_semantics<arbitrary>], iteration_bounds = array<i64: 1>, scalar_prefetch = 0 : i64, scratch_operands = 0 : i64, tpu.core_type = #tpu.core_type<tc>, window_params = [{transform_indices = @transform_0, window_bounds = array<i64: 256, 128>}, {transform_indices = @transform_1, window_bounds = array<i64: 256, 128>}, {transform_indices = @transform_2, window_bounds = array<i64: 256, 128>}, {transform_indices = @transform_3, window_bounds = array<i64: 256, 128>}, {transform_indices = @transform_4, window_bounds = array<i64: 256, 128>}, {transform_indices = @transform_5, window_bounds = array<i64: 2, 256, 128>}, {pipeline_mode = #tpu.pipeline_mode<synchronous>, transform_indices = @transform_6, window_bounds = array<i64: 1, 128>}, {pipeline_mode = #tpu.pipeline_mode<synchronous>, transform_indices = @transform_7, window_bounds = array<i64: 1, 128>}, {pipeline_mode = #tpu.pipeline_mode<synchronous>, transform_indices = @transform_8, window_bounds = array<i64: 1, 128>}, {pipeline_mode = #tpu.pipeline_mode<synchronous>, transform_indices = @transform_9, window_bounds = array<i64: 1, 128>}]} {
    %c0_i32 = arith.constant 0 : i32
    %0 = arith.cmpi eq, %arg0, %c0_i32 : i32
    %1 = arith.extui %0 : i1 to i32
    %c0_i32_0 = arith.constant 0 : i32
    %2 = arith.cmpi ne, %1, %c0_i32_0 : i32
    scf.if %2 {
      %cst_40 = arith.constant 0.000000e+00 : f32
      %54 = vector.broadcast %cst_40 : f32 to vector<1x128xf32>
      %c0_41 = arith.constant 0 : index
      %c0_42 = arith.constant 0 : index
      %55 = vector.load %arg7[%c0_41, %c0_42] : memref<1x128xf32, #tpu.memory_space<vmem>>, vector<1x128xf32>
      tpu.vector_store %arg7[%c0_41, %c0_42], %54 {strides = array<i32>} : memref<1x128xf32, #tpu.memory_space<vmem>>, vector<1x128xf32>,
      %cst_43 = arith.constant 0.000000e+00 : f32
      %56 = vector.broadcast %cst_43 : f32 to vector<1x128xf32>
      %c0_44 = arith.constant 0 : index
      %c0_45 = arith.constant 0 : index
      %57 = vector.load %arg8[%c0_44, %c0_45] : memref<1x128xf32, #tpu.memory_space<vmem>>, vector<1x128xf32>
      tpu.vector_store %arg8[%c0_44, %c0_45], %56 {strides = array<i32>} : memref<1x128xf32, #tpu.memory_space<vmem>>, vector<1x128xf32>,
      %c0_i32_46 = arith.constant 0 : i32
      %58 = vector.broadcast %c0_i32_46 : i32 to vector<1x128xi32>
      %c0_47 = arith.constant 0 : index
      %c0_48 = arith.constant 0 : index
      %59 = vector.load %arg9[%c0_47, %c0_48] : memref<1x128xi32, #tpu.memory_space<vmem>>, vector<1x128xi32>
      tpu.vector_store %arg9[%c0_47, %c0_48], %58 {strides = array<i32>} : memref<1x128xi32, #tpu.memory_space<vmem>>, vector<1x128xi32>,
      %c0_i32_49 = arith.constant 0 : i32
      %60 = vector.broadcast %c0_i32_49 : i32 to vector<1x128xi32>
      %c0_50 = arith.constant 0 : index
      %c0_51 = arith.constant 0 : index
      %61 = vector.load %arg10[%c0_50, %c0_51] : memref<1x128xi32, #tpu.memory_space<vmem>>, vector<1x128xi32>
      tpu.vector_store %arg10[%c0_50, %c0_51], %60 {strides = array<i32>} : memref<1x128xi32, #tpu.memory_space<vmem>>, vector<1x128xi32>,
    } else {
    }
    %c0 = arith.constant 0 : index
    %c0_1 = arith.constant 0 : index
    %3 = vector.load %arg5[%c0, %c0_1] : memref<256x128xf32, #tpu.memory_space<vmem>>, vector<256x128xf32>
    %c0_2 = arith.constant 0 : index
    %c0_3 = arith.constant 0 : index
    %4 = vector.load %arg1[%c0_2, %c0_3] : memref<256x128xf32, #tpu.memory_space<vmem>>, vector<256x128xf32>
    %c0_4 = arith.constant 0 : index
    %c0_5 = arith.constant 0 : index
    %5 = vector.load %arg2[%c0_4, %c0_5] : memref<256x128xf32, #tpu.memory_space<vmem>>, vector<256x128xf32>
    %6 = arith.subf %4, %5 : vector<256x128xf32>
    %7 = arith.mulf %6, %6 : vector<256x128xf32>
    %8 = arith.mulf %7, %3 : vector<256x128xf32>
    %cst = arith.constant 1.000000e-01 : f32
    %9 = vector.broadcast %cst : f32 to vector<256x128xf32>
    %10 = arith.cmpf ogt, %4, %9 : vector<256x128xf32>
    %c0_6 = arith.constant 0 : index
    %c0_7 = arith.constant 0 : index
    %11 = vector.load %arg7[%c0_6, %c0_7] : memref<1x128xf32, #tpu.memory_space<vmem>>, vector<1x128xf32>
    %cst_8 = arith.constant 0.000000e+00 : f32
    %12 = vector.broadcast %cst_8 : f32 to vector<256x128xf32>
    %13 = arith.select %10, %8, %12 : vector<256x128xi1>, vector<256x128xf32>
    %cst_9 = arith.constant dense<0.000000e+00> : vector<128xf32>
    %14 = vector.multi_reduction <add>, %13, %cst_9 [0] : vector<256x128xf32> to vector<128xf32>
    %15 = vector.shape_cast %14 : vector<128xf32> to vector<1x128xf32>
    %16 = arith.addf %11, %15 : vector<1x128xf32>
    %c0_10 = arith.constant 0 : index
    %c0_11 = arith.constant 0 : index
    %17 = vector.load %arg7[%c0_10, %c0_11] : memref<1x128xf32, #tpu.memory_space<vmem>>, vector<1x128xf32>
    tpu.vector_store %arg7[%c0_10, %c0_11], %16 {strides = array<i32>} : memref<1x128xf32, #tpu.memory_space<vmem>>, vector<1x128xf32>,
    %c0_12 = arith.constant 0 : index
    %c0_13 = arith.constant 0 : index
    %18 = vector.load %arg9[%c0_12, %c0_13] : memref<1x128xi32, #tpu.memory_space<vmem>>, vector<1x128xi32>
    %19 = arith.extui %10 : vector<256x128xi1> to vector<256x128xi32>
    %cst_14 = arith.constant dense<0> : vector<128xi32>
    %20 = vector.multi_reduction <add>, %19, %cst_14 [0] : vector<256x128xi32> to vector<128xi32>
    %21 = vector.shape_cast %20 : vector<128xi32> to vector<1x128xi32>
    %22 = arith.addi %18, %21 : vector<1x128xi32>
    %c0_15 = arith.constant 0 : index
    %c0_16 = arith.constant 0 : index
    %23 = vector.load %arg9[%c0_15, %c0_16] : memref<1x128xi32, #tpu.memory_space<vmem>>, vector<1x128xi32>
    tpu.vector_store %arg9[%c0_15, %c0_16], %22 {strides = array<i32>} : memref<1x128xi32, #tpu.memory_space<vmem>>, vector<1x128xi32>,
    %cst_17 = arith.constant 0.000000e+00 : f32
    %24 = vector.broadcast %cst_17 : f32 to vector<256x128xf32>
    %25 = arith.select %10, %24, %8 : vector<256x128xi1>, vector<256x128xf32>
    %c0_18 = arith.constant 0 : index
    %c0_19 = arith.constant 0 : index
    %c0_20 = arith.constant 0 : index
    %26 = vector.load %arg6[%c0_18, %c0_19, %c0_20] : memref<2x256x128xf32, #tpu.memory_space<vmem>>, vector<1x256x128xf32>
    %27 = vector.shape_cast %26 : vector<1x256x128xf32> to vector<256x128xf32>
    %28 = vector.shape_cast %25 : vector<256x128xf32> to vector<1x256x128xf32>
    tpu.vector_store %arg6[%c0_18, %c0_19, %c0_20], %28 {strides = array<i32>} : memref<2x256x128xf32, #tpu.memory_space<vmem>>, vector<1x256x128xf32>,
    %c0_21 = arith.constant 0 : index
    %c0_22 = arith.constant 0 : index
    %29 = vector.load %arg3[%c0_21, %c0_22] : memref<256x128xf32, #tpu.memory_space<vmem>>, vector<256x128xf32>
    %c0_23 = arith.constant 0 : index
    %c0_24 = arith.constant 0 : index
    %30 = vector.load %arg4[%c0_23, %c0_24] : memref<256x128xf32, #tpu.memory_space<vmem>>, vector<256x128xf32>
    %31 = arith.subf %29, %30 : vector<256x128xf32>
    %32 = arith.mulf %31, %31 : vector<256x128xf32>
    %33 = arith.mulf %32, %3 : vector<256x128xf32>
    %cst_25 = arith.constant 1.000000e-01 : f32
    %34 = vector.broadcast %cst_25 : f32 to vector<256x128xf32>
    %35 = arith.cmpf ogt, %29, %34 : vector<256x128xf32>
    %c0_26 = arith.constant 0 : index
    %c0_27 = arith.constant 0 : index
    %36 = vector.load %arg8[%c0_26, %c0_27] : memref<1x128xf32, #tpu.memory_space<vmem>>, vector<1x128xf32>
    %cst_28 = arith.constant 0.000000e+00 : f32
    %37 = vector.broadcast %cst_28 : f32 to vector<256x128xf32>
    %38 = arith.select %35, %33, %37 : vector<256x128xi1>, vector<256x128xf32>
    %cst_29 = arith.constant dense<0.000000e+00> : vector<128xf32>
    %39 = vector.multi_reduction <add>, %38, %cst_29 [0] : vector<256x128xf32> to vector<128xf32>
    %40 = vector.shape_cast %39 : vector<128xf32> to vector<1x128xf32>
    %41 = arith.addf %36, %40 : vector<1x128xf32>
    %c0_30 = arith.constant 0 : index
    %c0_31 = arith.constant 0 : index
    %42 = vector.load %arg8[%c0_30, %c0_31] : memref<1x128xf32, #tpu.memory_space<vmem>>, vector<1x128xf32>
    tpu.vector_store %arg8[%c0_30, %c0_31], %41 {strides = array<i32>} : memref<1x128xf32, #tpu.memory_space<vmem>>, vector<1x128xf32>,
    %c0_32 = arith.constant 0 : index
    %c0_33 = arith.constant 0 : index
    %43 = vector.load %arg10[%c0_32, %c0_33] : memref<1x128xi32, #tpu.memory_space<vmem>>, vector<1x128xi32>
    %44 = arith.extui %35 : vector<256x128xi1> to vector<256x128xi32>
    %cst_34 = arith.constant dense<0> : vector<128xi32>
    %45 = vector.multi_reduction <add>, %44, %cst_34 [0] : vector<256x128xi32> to vector<128xi32>
    %46 = vector.shape_cast %45 : vector<128xi32> to vector<1x128xi32>
    %47 = arith.addi %43, %46 : vector<1x128xi32>
    %c0_35 = arith.constant 0 : index
    %c0_36 = arith.constant 0 : index
    %48 = vector.load %arg10[%c0_35, %c0_36] : memref<1x128xi32, #tpu.memory_space<vmem>>, vector<1x128xi32>
    tpu.vector_store %arg10[%c0_35, %c0_36], %47 {strides = array<i32>} : memref<1x128xi32, #tpu.memory_space<vmem>>, vector<1x128xi32>,
    %cst_37 = arith.constant 0.000000e+00 : f32
    %49 = vector.broadcast %cst_37 : f32 to vector<256x128xf32>
    %50 = arith.select %35, %49, %33 : vector<256x128xi1>, vector<256x128xf32>
    %c1 = arith.constant 1 : index
    %c0_38 = arith.constant 0 : index
    %c0_39 = arith.constant 0 : index
    %51 = vector.load %arg6[%c1, %c0_38, %c0_39] : memref<2x256x128xf32, #tpu.memory_space<vmem>>, vector<1x256x128xf32>
    %52 = vector.shape_cast %51 : vector<1x256x128xf32> to vector<256x128xf32>
    %53 = vector.shape_cast %50 : vector<256x128xf32> to vector<1x256x128xf32>
    tpu.vector_store %arg6[%c1, %c0_38, %c0_39], %53 {strides = array<i32>} : memref<2x256x128xf32, #tpu.memory_space<vmem>>, vector<1x256x128xf32>,
    return
  }
  func.func @transform_0(%arg0: i32) -> (i32, i32) {
    %c0_i32 = arith.constant 0 : i32
    %c0_i32_0 = arith.constant 0 : i32
    return %arg0, %c0_i32 : i32, i32
  }
  func.func @transform_1(%arg0: i32) -> (i32, i32) {
    %c0_i32 = arith.constant 0 : i32
    %c0_i32_0 = arith.constant 0 : i32
    return %arg0, %c0_i32 : i32, i32
  }
  func.func @transform_2(%arg0: i32) -> (i32, i32) {
    %c0_i32 = arith.constant 0 : i32
    %c0_i32_0 = arith.constant 0 : i32
    return %arg0, %c0_i32 : i32, i32
  }
  func.func @transform_3(%arg0: i32) -> (i32, i32) {
    %c0_i32 = arith.constant 0 : i32
    %c0_i32_0 = arith.constant 0 : i32
    return %arg0, %c0_i32 : i32, i32
  }
  func.func @transform_4(%arg0: i32) -> (i32, i32) {
    %c0_i32 = arith.constant 0 : i32
    %c0_i32_0 = arith.constant 0 : i32
    return %arg0, %c0_i32 : i32, i32
  }
  func.func @transform_5(%arg0: i32) -> (i32, i32, i32) {
    %c0_i32 = arith.constant 0 : i32
    %c0_i32_0 = arith.constant 0 : i32
    %c0_i32_1 = arith.constant 0 : i32
    return %c0_i32, %arg0, %c0_i32_0 : i32, i32, i32
  }
  func.func @transform_6(%arg0: i32) -> (i32, i32) {
    %c0_i32 = arith.constant 0 : i32
    %c0_i32_0 = arith.constant 0 : i32
    %c0_i32_1 = arith.constant 0 : i32
    return %c0_i32, %c0_i32_0 : i32, i32
  }
  func.func @transform_7(%arg0: i32) -> (i32, i32) {
    %c0_i32 = arith.constant 0 : i32
    %c0_i32_0 = arith.constant 0 : i32
    %c0_i32_1 = arith.constant 0 : i32
    return %c0_i32, %c0_i32_0 : i32, i32
  }
  func.func @transform_8(%arg0: i32) -> (i32, i32) {
    %c0_i32 = arith.constant 0 : i32
    %c0_i32_0 = arith.constant 0 : i32
    %c0_i32_1 = arith.constant 0 : i32
    return %c0_i32, %c0_i32_0 : i32, i32
  }
  func.func @transform_9(%arg0: i32) -> (i32, i32) {
    %c0_i32 = arith.constant 0 : i32
    %c0_i32_0 = arith.constant 0 : i32
    %c0_i32_1 = arith.constant 0 : i32
    return %c0_i32, %c0_i32_0 : i32, i32
  }
}

</mosaic_0001>

<bundles_post_ra>
// kernel: loss_ohem_forward.3
= control target key start
LH: loop header
LB: loop body
LE: loop exit
PB: predicated region body
PF: predicated region fallthrough
CT: control target
= control target key end

     0   :  { %s1626_s0 = inlined_call_operand.vmem [shape: s32[2], index: 0, kind: input, shape index: {}]   ;;  %s1627_s1 = inlined_call_operand.vmem [shape: f32[2,256,128], index: 1, kind: input, shape index: {}]   ;;  %s1628_s2 = inlined_call_operand.vmem [shape: f32[2,1,128], index: 2, kind: output, shape index: {0}]   ;;  %s1629_s3 = inlined_call_operand.vmem [shape: s32[2,1,128], index: 3, kind: output, shape index: {1}]   ;;  %s1630_s4 = inlined_call_operand.vmem [shape: s32[2,1,128], index: 4, kind: output, shape index: {2}]  }
   0x1   :  { %s10_s17 = sshll.u32 %s1626_s0, 4  ;;  %s11_s17 = int_to_ptr.vmem [resolvable:$true] %s10_s17 }
   0x2   :  { %s779_s18 = scalar_lea.vmem %s11_s17, 16  ;;  %p784_p1 = scmp.lt.s32.totalorder %s11_s17, %s11_s17 }
   0x3   :  { %p780_p0 = scmp.ne.s32.totalorder %s11_s17, %s779_s18  ;;  %p785_p2 = scmp.lt.s32.totalorder %s779_s18, %s779_s18 }
   0x5   :  { %p786_p3 = por %p785_p2, %p784_p1 }
   0x7   :  { %p787_p4 = pnand %p786_p3, %p780_p0 }
   0x9   :  { %790 = shalt.err (!%p787_p4)  }
   0xa   :  { %s825_s19 = smov [#allocation3]  }
   0xb   :  { %13 = dma.vmem_to_smem %s11_s17, 16, %s825_s19, [#allocation2] }
   0xc   :  { %807 = dma.done.wait [#allocation2], 16 }
   0xd   :  { %808 = vsyncadd [#allocation2], 4294967280 }
   0xe   :  { %15 = sfence }
   0xf   :  { %s856_s20 = smov 0  }
  0x10 LB: > { %s732_s0 = sadd.s32 4294967295, %s811_s20   ;;  %p736_p5 = scmp.ge.s32.totalorder %s811_s20, 1  ;;  %s811_s20 = sphi %s856_s20, %s21_s20  }
  0x11   : > { %p149_p6 = scmp.lt.s32.totalorder %s811_s20, 3 }
  0x13   : > { %p150_p7 = pnand %p736_p5, %p149_p6 }
  0x14   : > { %p177_p8 = scmp.lt.s32.totalorder (!%p150_p7), %s732_s0, 1  ;;  %s864_s21 = sld [smem:[#allocation3 + %s732_s0]] (!%p150_p7) }
  0x15   : > { %153 = sbr.rel (%p150_p7) target bundleno = 368 (0x170), region = 24  ;;  %s886_s9 = smov (!%p150_p7), 2139095041  }
  0x16   : > { %s888_s10 = smov (!%p150_p7), 0   ;;  %s890_s11 = smov (!%p150_p7), 0  }
  0x1c   : > { %s1661_s0 = smov (!%p177_p8, %s732_s0), 1 }
  0x1d   : > { %s741_s22 = sshll.u32 %s1661_s0, 8  ;;  %s184_s25 = scalar_lea.vmem %s1628_s2, %s1661_s0 }
  0x1e   : > { %s876_s28 = scalar_lea.vmem %s1627_s1, %s741_s22  ;;  %s187_s5 = scalar_lea.vmem %s1629_s3, %s1661_s0 }
  0x1f   : > { %s190_s8 = scalar_lea.vmem %s1630_s4, %s1661_s0 }
  0x20 LB: >> { %s200_s12 = ssub.s32 %s815_s9, %s819_s10  ;;  %v907_v0 = vld [vmem:[%s876_s28] sm:$0xff]  ;;  %v910_v1 = vld [vmem:[%s876_s28 + $0x8] sm:$0xff]  ;;  %v913_v2 = vld [vmem:[%s876_s28 + $0x10] sm:$0xff]  ;;  %v826_v33 = vmov 0   ;;  %s197_s11 = sadd.s32 1, %s823_s11   ;;  %s823_s11 = sphi %s890_s11, %s197_s11   ;;  %s819_s10 = sphi %s888_s10, %s1643_s10   ;;  %s815_s9 = sphi %s886_s9, %s1663_s9  }
  0x21   : >> { %s201_s13 = sshra.s32 %s200_s12, 1  ;;  %v916_v3 = vld [vmem:[%s876_s28 + $0x18] sm:$0xff]  ;;  %v919_v4 = vld [vmem:[%s876_s28 + $0x20] sm:$0xff]  ;;  %v922_v5 = vld [vmem:[%s876_s28 + $0x28] sm:$0xff]  ;;  %p194_p10 = scmp.ge.s32.totalorder %s197_s11, 32  }
  0x22   : >> { %s904_s14 = sadd.s32 %s819_s10, %s201_s13  ;;  %v925_v6 = vld [vmem:[%s876_s28 + $0x30] sm:$0xff]  ;;  %v928_v7 = vld [vmem:[%s876_s28 + $0x38] sm:$0xff]  ;;  %v931_v8 = vld [vmem:[%s876_s28 + $0x40] sm:$0xff] }
  0x23   : >> { %v934_v9 = vld [vmem:[%s876_s28 + $0x48] sm:$0xff]  ;;  %v937_v10 = vstv %s904_s14  ;;  %v940_v11 = vld [vmem:[%s876_s28 + $0x50] sm:$0xff]  ;;  %v943_v12 = vld [vmem:[%s876_s28 + $0x58] sm:$0xff] }
  0x24   : >> { %v946_v13 = vld [vmem:[%s876_s28 + $0x60] sm:$0xff]  ;;  %v949_v14 = vld [vmem:[%s876_s28 + $0x68] sm:$0xff]  ;;  %v952_v15 = vld [vmem:[%s876_s28 + $0x70] sm:$0xff]  ;;  %vm268_vm0 = vcmp.ge.s32.totalorder %v907_v0, %v937_v10  ;;  %vm269_vm1 = vcmp.ge.s32.totalorder %v910_v1, %v937_v10  ;;  %vm270_vm2 = vcmp.ge.s32.totalorder %v913_v2, %v937_v10  ;;  %vm271_vm3 = vcmp.ge.s32.totalorder %v916_v3, %v937_v10 }
  0x25   : >> { %v955_v16 = vld [vmem:[%s876_s28 + $0x78] sm:$0xff]  ;;  %v958_v17 = vld [vmem:[%s876_s28 + $0x80] sm:$0xff]  ;;  %v961_v18 = vld [vmem:[%s876_s28 + $0x88] sm:$0xff]  ;;  %vm272_vm4 = vcmp.ge.s32.totalorder %v919_v4, %v937_v10  ;;  %vm273_vm5 = vcmp.ge.s32.totalorder %v922_v5, %v937_v10  ;;  %vm274_vm6 = vcmp.ge.s32.totalorder %v925_v6, %v937_v10  ;;  %vm275_vm7 = vcmp.ge.s32.totalorder %v928_v7, %v937_v10 }
  0x26   : >> { %v964_v19 = vld [vmem:[%s876_s28 + $0x90] sm:$0xff]  ;;  %v975_v20 = vld [vmem:[%s876_s28 + $0x98] sm:$0xff]  ;;  %v978_v21 = vld [vmem:[%s876_s28 + $0xa0] sm:$0xff]  ;;  %vm276_vm8 = vcmp.ge.s32.totalorder %v931_v8, %v937_v10  ;;  %v300_v34 = vsel %vm268_vm0, 1, %v826_v33  ;;  %v301_v35 = vsel %vm269_vm1, 1, %v826_v33  ;;  %v302_v36 = vsel %vm270_vm2, 1, %v826_v33 }
  0x27   : >> { %v981_v22 = vld [vmem:[%s876_s28 + $0xa8] sm:$0xff]  ;;  %v992_v23 = vld [vmem:[%s876_s28 + $0xb0] sm:$0xff]  ;;  %v995_v24 = vld [vmem:[%s876_s28 + $0xb8] sm:$0xff]  ;;  %v303_v37 = vsel %vm271_vm3, 1, %v826_v33  ;;  %v304_v38 = vsel %vm272_vm4, 1, %v826_v33  ;;  %v305_v39 = vsel %vm273_vm5, 1, %v826_v33  ;;  %vm1631_vm4 = vcmp.ge.s32.totalorder %v934_v9, %v937_v10 }
  0x28   : >> { %v998_v25 = vld [vmem:[%s876_s28 + $0xc0] sm:$0xff]  ;;  %v1009_v26 = vld [vmem:[%s876_s28 + $0xc8] sm:$0xff]  ;;  %v1012_v27 = vld [vmem:[%s876_s28 + $0xd0] sm:$0xff]  ;;  %vm289_vm11 = vcmp.ge.s32.totalorder %v981_v22, %v937_v10  ;;  %vm290_vm10 = vcmp.ge.s32.totalorder %v992_v23, %v937_v10  ;;  %vm291_vm12 = vcmp.ge.s32.totalorder %v995_v24, %v937_v10  ;;  %v306_v40 = vsel %vm274_vm6, 1, %v826_v33 }
  0x29   : >> { %v1015_v28 = vld [vmem:[%s876_s28 + $0xd8] sm:$0xff]  ;;  %v1026_v29 = vld [vmem:[%s876_s28 + $0xe0] sm:$0xff]  ;;  %v1037_v30 = vld [vmem:[%s876_s28 + $0xe8] sm:$0xff]  ;;  %vm292_vm13 = vcmp.ge.s32.totalorder %v998_v25, %v937_v10  ;;  %vm293_vm14 = vcmp.ge.s32.totalorder %v1009_v26, %v937_v10  ;;  %vm294_vm9 = vcmp.ge.s32.totalorder %v1012_v27, %v937_v10  ;;  %v307_v41 = vsel %vm275_vm7, 1, %v826_v33 }
  0x2a   : >> { %v1040_v31 = vld [vmem:[%s876_s28 + $0xf0] sm:$0xff]  ;;  %v1043_v32 = vld [vmem:[%s876_s28 + $0xf8] sm:$0xff]  ;;  %vm295_vm15 = vcmp.ge.s32.totalorder %v1015_v28, %v937_v10  ;;  %vm296_vm0 = vcmp.ge.s32.totalorder %v1026_v29, %v937_v10  ;;  %vm297_vm1 = vcmp.ge.s32.totalorder %v1037_v30, %v937_v10  ;;  %v308_v42 = vsel %vm276_vm8, 1, %v826_v33 }
  0x2b   : >> { %vm298_vm2 = vcmp.ge.s32.totalorder %v1040_v31, %v937_v10  ;;  %vm299_vm3 = vcmp.ge.s32.totalorder %v1043_v32, %v937_v10  ;;  %v309_v43 = vsel %vm1631_vm4, 1, %v826_v33  ;;  %vm1632_vm5 = vcmp.ge.s32.totalorder %v940_v11, %v937_v10 }
  0x2c   : >> { %v310_v44 = vsel %vm1632_vm5, 1, %v826_v33  ;;  %vm1633_vm6 = vcmp.ge.s32.totalorder %v943_v12, %v937_v10  ;;  %v332_v46 = vadd.s32 %v304_v38, %v300_v34  ;;  %v333_v47 = vadd.s32 %v305_v39, %v301_v35 }
  0x2d   : >> { %v311_v45 = vsel %vm1633_vm6, 1, %v826_v33  ;;  %v334_v48 = vadd.s32 %v306_v40, %v302_v36  ;;  %v335_v49 = vadd.s32 %v307_v41, %v303_v37  ;;  %vm1634_vm7 = vcmp.ge.s32.totalorder %v946_v13, %v937_v10 }
  0x2e   : >> { %v312_v50 = vsel %vm1634_vm7, 1, %v826_v33  ;;  %vm1635_vm8 = vcmp.ge.s32.totalorder %v949_v14, %v937_v10  ;;  %vm1636_vm4 = vcmp.ge.s32.totalorder %v952_v15, %v937_v10  ;;  %vm1637_vm5 = vcmp.ge.s32.totalorder %v955_v16, %v937_v10 }
  0x2f   : >> { %v313_v51 = vsel %vm1635_vm8, 1, %v826_v33  ;;  %v314_v52 = vsel %vm1636_vm4, 1, %v826_v33  ;;  %v315_v53 = vsel %vm1637_vm5, 1, %v826_v33  ;;  %v336_v54 = vadd.s32 %v332_v46, %v308_v42 }
  0x30   : >> { %v337_v55 = vadd.s32 %v333_v47, %v309_v43  ;;  %v338_v56 = vadd.s32 %v334_v48, %v310_v44  ;;  %v339_v57 = vadd.s32 %v335_v49, %v311_v45  ;;  %vm1638_vm6 = vcmp.ge.s32.totalorder %v958_v17, %v937_v10 }
  0x31   : >> { %v316_v58 = vsel %vm1638_vm6, 1, %v826_v33  ;;  %vm1639_vm7 = vcmp.ge.s32.totalorder %v961_v18, %v937_v10  ;;  %vm1640_vm8 = vcmp.ge.s32.totalorder %v964_v19, %v937_v10  ;;  %vm1641_vm4 = vcmp.ge.s32.totalorder %v975_v20, %v937_v10 }
  0x32   : >> { %v317_v59 = vsel %vm1639_vm7, 1, %v826_v33  ;;  %v318_v60 = vsel %vm1640_vm8, 1, %v826_v33  ;;  %v319_v61 = vsel %vm1641_vm4, 1, %v826_v33  ;;  %v340_v62 = vadd.s32 %v336_v54, %v312_v50  ;;  %v1186_v50 = vld [vmem:[%s876_s28] sm:$0xff] (%p194_p10) }
  0x33   : >> { %v341_v63 = vadd.s32 %v337_v55, %v313_v51  ;;  %v342_v0 = vadd.s32 %v338_v56, %v314_v52  ;;  %v343_v1 = vadd.s32 %v339_v57, %v315_v53  ;;  %vm1642_vm5 = vcmp.ge.s32.totalorder %v978_v21, %v937_v10  ;;  %v1189_v51 = vld [vmem:[%s876_s28 + $0x8] sm:$0xff] (%p194_p10)  ;;  %v1192_v52 = vld [vmem:[%s876_s28 + $0x10] sm:$0xff] (%p194_p10)  ;;  %v1195_v53 = vld [vmem:[%s876_s28 + $0x18] sm:$0xff] (%p194_p10) }
  0x34   : >> { %v320_v2 = vsel %vm1642_vm5, 1, %v826_v33  ;;  %v321_v3 = vsel %vm289_vm11, 1, %v826_v33  ;;  %v322_v4 = vsel %vm290_vm10, 1, %v826_v33  ;;  %v323_v5 = vsel %vm291_vm12, 1, %v826_v33  ;;  %v1198_v54 = vld [vmem:[%s876_s28 + $0x20] sm:$0xff] (%p194_p10)  ;;  %v1201_v55 = vld [vmem:[%s876_s28 + $0x28] sm:$0xff] (%p194_p10) }
  0x35   : >> { %v344_v6 = vadd.s32 %v340_v62, %v316_v58  ;;  %v345_v7 = vadd.s32 %v341_v63, %v317_v59  ;;  %v346_v8 = vadd.s32 %v342_v0, %v318_v60  ;;  %v347_v9 = vadd.s32 %v343_v1, %v319_v61  ;;  %v1204_v56 = vld [vmem:[%s876_s28 + $0x30] sm:$0xff] (%p194_p10)  ;;  %v1211_v57 = vld [vmem:[%s876_s28 + $0x38] sm:$0xff] (%p194_p10)  ;;  %v1214_v58 = vld [vmem:[%s876_s28 + $0x40] sm:$0xff] (%p194_p10) }
  0x36   : >> { %v324_v11 = vsel %vm292_vm13, 1, %v826_v33  ;;  %v325_v12 = vsel %vm293_vm14, 1, %v826_v33  ;;  %v326_v13 = vsel %vm294_vm9, 1, %v826_v33  ;;  %v327_v14 = vsel %vm295_vm15, 1, %v826_v33  ;;  %v1217_v59 = vld [vmem:[%s876_s28 + $0x48] sm:$0xff] (%p194_p10)  ;;  %v1220_v60 = vld [vmem:[%s876_s28 + $0x50] sm:$0xff] (%p194_p10) }
  0x37   : >> { %v348_v15 = vadd.s32 %v344_v6, %v320_v2  ;;  %v349_v16 = vadd.s32 %v345_v7, %v321_v3  ;;  %v350_v17 = vadd.s32 %v346_v8, %v322_v4  ;;  %v351_v18 = vadd.s32 %v347_v9, %v323_v5  ;;  %v1223_v61 = vld [vmem:[%s876_s28 + $0x58] sm:$0xff] (%p194_p10)  ;;  %v1226_v62 = vld [vmem:[%s876_s28 + $0x60] sm:$0xff] (%p194_p10)  ;;  %v1233_v63 = vld [vmem:[%s876_s28 + $0x68] sm:$0xff] (%p194_p10) }
  0x38   : >> { %v328_v19 = vsel %vm296_vm0, 1, %v826_v33  ;;  %v329_v20 = vsel %vm297_vm1, 1, %v826_v33  ;;  %v330_v21 = vsel %vm298_vm2, 1, %v826_v33  ;;  %v331_v22 = vsel %vm299_vm3, 1, %v826_v33  ;;  %v1236_v0 = vld [vmem:[%s876_s28 + $0x70] sm:$0xff] (%p194_p10)  ;;  %v1251_v3 = vld [vmem:[%s876_s28 + $0x78] sm:$0xff] (%p194_p10) }
  0x39   : >> { %v352_v23 = vadd.s32 %v348_v15, %v324_v11  ;;  %v353_v24 = vadd.s32 %v349_v16, %v325_v12  ;;  %v354_v25 = vadd.s32 %v350_v17, %v326_v13  ;;  %v355_v26 = vadd.s32 %v351_v18, %v327_v14  ;;  %v1254_v4 = vld [vmem:[%s876_s28 + $0x80] sm:$0xff] (%p194_p10)  ;;  %v1257_v5 = vld [vmem:[%s876_s28 + $0x88] sm:$0xff] (%p194_p10)  ;;  %v1268_v6 = vld [vmem:[%s876_s28 + $0x90] sm:$0xff] (%p194_p10) }
  0x3a   : > { %v1271_v7 = vld [vmem:[%s876_s28 + $0x98] sm:$0xff] (%p194_p10)  ;;  %v1284_v9 = vld [vmem:[%s876_s28 + $0xa0] sm:$0xff] (%p194_p10)  ;;  %v1295_v13 = vld [vmem:[%s876_s28 + $0xa8] sm:$0xff] (%p194_p10) }
  0x3b   : >> { %v356_v27 = vadd.s32 %v352_v23, %v328_v19  ;;  %v357_v28 = vadd.s32 %v353_v24, %v329_v20  ;;  %v358_v29 = vadd.s32 %v354_v25, %v330_v21  ;;  %v359_v34 = vadd.s32 %v355_v26, %v331_v22  ;;  %v1298_v14 = vld [vmem:[%s876_s28 + $0xb0] sm:$0xff] (%p194_p10)  ;;  %v1311_v16 = vld [vmem:[%s876_s28 + $0xb8] sm:$0xff] (%p194_p10)  ;;  %v1314_v17 = vld [vmem:[%s876_s28 + $0xc0] sm:$0xff] (%p194_p10) }
  0x3c   : > { %v1329_v21 = vld [vmem:[%s876_s28 + $0xc8] sm:$0xff] (%p194_p10)  ;;  %v1332_v22 = vld [vmem:[%s876_s28 + $0xd0] sm:$0xff] (%p194_p10) }
  0x3d   : >> { %v360_v35 = vadd.s32 %v357_v28, %v356_v27  ;;  %v361_v36 = vadd.s32 %v359_v34, %v358_v29  ;;  %v1357_v27 = vld [vmem:[%s876_s28 + $0xd8] sm:$0xff] (%p194_p10)  ;;  %v1360_v28 = vld [vmem:[%s876_s28 + $0xe0] sm:$0xff] (%p194_p10)  ;;  %v1363_v29 = vld [vmem:[%s876_s28 + $0xe8] sm:$0xff] (%p194_p10) }
  0x3f   : >> { %v362_v30 = vadd.s32 %v361_v36, %v360_v35 }
  0x41   : >> { %v363_v37 = vrot.slane %v362_v30, 4 }
  0x43   : >> { %v364_v38 = vadd.s32 %v363_v37, %v362_v30  ;;  %v827_v30 = vmov (%p194_p10), 0  }
  0x45   : >> { %v365_v39 = vrot.slane %v364_v38, 2 }
  0x47   : >> { %v366_v31 = vadd.s32 %v365_v39, %v364_v38  ;;  %v1386_v38 = vld [vmem:[%s876_s28 + $0xf0] sm:$0xff] (%p194_p10)  ;;  %v1389_v39 = vld [vmem:[%s876_s28 + $0xf8] sm:$0xff] (%p194_p10) }
  0x49   : >> { %v367_v40 = vrot.slane %v366_v31, 1 }
  0x4b   : >> { %v368_v41 = vadd.s32 %v367_v40, %v366_v31 }
  0x4d   : >> { %v370_v10 = vshrl.u32 %v368_v41, 16  ;;  %v369_v32 = vand.u32 65535, %v368_v41 }
  0x4f   : >> { %v372_v33 = vcvt.s32.f32 %v370_v10  ;;  %v371_v42 = vcvt.s32.f32 %v369_v32 }
  0x51   : >> { %375 = vadd.xlane.f32.xlu0 %v372_v33 }
  0x55   : >> { %373 = vadd.xlane.f32.xlu0 %v371_v42 }
  0xde   : >> { %v376_v43 = vpop.xlane.xlu0 %375 }
  0xdf   : >> { %v378_v44 = vcvt.f32.s32 %v376_v43 }
  0xe1   : >> { %v379_v46 = vshll.u32 %v378_v44, 16 }
  0xe2   : >> { %v374_v45 = vpop.xlane.xlu0 %373 }
  0xe3   : >> { %v377_v47 = vcvt.f32.s32 %v374_v45 }
  0xe5   : >> { %v380_v48 = vadd.s32 %v379_v46, %v377_v47 }
  0xe7   : >> { %742 = vpush %v380_v48 }
 0x117   : > { %196 = sbr.rel (!%p194_p10) target bundleno = 32 (0x20), region = 85 }
 0x118   : >> { %s743_s15 = spop %742 }
 0x119   : >> { %p382_p9 = scmp.ge.s32.totalorder %s743_s15, %s864_s21 }
 0x11b   : >> { %s383_s16 = scalar_select %p382_p9, %s904_s14, %s819_s10  }
 0x11c   : >> { %s1663_s9 = smov (!%p382_p9, %s815_s9), %s904_s14 }
 0x11d   : >> { %s1643_s10 = smov %s383_s16  ;;  %v1177_v49 = vstv (%p194_p10), %s383_s16 }
 0x11e   : > { %623 = vst [vmem:[%s190_s8] sm:$0x1] %v1177_v49  ;;  %vm450_vm9 = vcmp.gt.s32.totalorder %v1186_v50, %v1177_v49  ;;  %vm451_vm10 = vcmp.gt.s32.totalorder %v1189_v51, %v1177_v49  ;;  %vm452_vm11 = vcmp.gt.s32.totalorder %v1192_v52, %v1177_v49  ;;  %vm453_vm12 = vcmp.gt.s32.totalorder %v1195_v53, %v1177_v49 }
 0x11f   : > { %vm454_vm13 = vcmp.gt.s32.totalorder %v1198_v54, %v1177_v49  ;;  %vm455_vm14 = vcmp.gt.s32.totalorder %v1201_v55, %v1177_v49  ;;  %v482_v1 = vsel %vm450_vm9, %v1186_v50, 0.0  ;;  %v483_v2 = vsel %vm451_vm10, %v1189_v51, 0.0 }
 0x120   : > { %vm456_vm15 = vcmp.gt.s32.totalorder %v1204_v56, %v1177_v49  ;;  %vm457_vm0 = vcmp.gt.s32.totalorder %v1211_v57, %v1177_v49  ;;  %vm458_vm1 = vcmp.gt.s32.totalorder %v1214_v58, %v1177_v49  ;;  %vm459_vm2 = vcmp.gt.s32.totalorder %v1217_v59, %v1177_v49 }
 0x121   : > { %vm460_vm3 = vcmp.gt.s32.totalorder %v1220_v60, %v1177_v49  ;;  %vm461_vm6 = vcmp.gt.s32.totalorder %v1223_v61, %v1177_v49  ;;  %vm462_vm7 = vcmp.gt.s32.totalorder %v1226_v62, %v1177_v49  ;;  %v484_v8 = vsel %vm452_vm11, %v1192_v52, 0.0 }
 0x122   : > { %v485_v11 = vsel %vm453_vm12, %v1195_v53, 0.0  ;;  %v514_v12 = vadd.f32 %v483_v2, %v482_v1  ;;  %vm467_vm4 = vcmp.gt.s32.totalorder %v1257_v5, %v1177_v49  ;;  %v486_v15 = vsel %vm454_vm13, %v1198_v54, 0.0 }
 0x123   : > { %v487_v18 = vsel %vm455_vm14, %v1201_v55, 0.0  ;;  %v488_v19 = vsel %vm456_vm15, %v1204_v56, 0.0  ;;  %v489_v23 = vsel %vm457_vm0, %v1211_v57, 0.0  ;;  %v490_v24 = vsel %vm458_vm1, %v1214_v58, 0.0 }
 0x124   : > { %v515_v20 = vadd.f32 %v514_v12, %v484_v8  ;;  %v1348_v25 = vsel %vm459_vm2, %v1217_v59, 0.0  ;;  %v1354_v26 = vsel %vm460_vm3, %v1220_v60, 0.0  ;;  %vm471_vm5 = vcmp.gt.s32.totalorder %v1295_v13, %v1177_v49 }
 0x125   : > { %v1373_v34 = vsel %vm461_vm6, %v1223_v61, 0.0  ;;  %v1379_v35 = vsel %vm462_vm7, %v1226_v62, 0.0  ;;  %v552_v37 = vsel %vm450_vm9, 1, %v827_v30  ;;  %vm473_vm8 = vcmp.gt.s32.totalorder %v1311_v16, %v1177_v49 }
 0x126   : > { %v516_v36 = vadd.f32 %v515_v20, %v485_v11  ;;  %v553_v31 = vsel %vm451_vm10, 1, %v827_v30  ;;  %v554_v40 = vsel %vm452_vm11, 1, %v827_v30  ;;  %v555_v41 = vsel %vm453_vm12, 1, %v827_v30 }
 0x127   : > { %v556_v10 = vsel %vm454_vm13, 1, %v827_v30  ;;  %vm474_vm9 = vcmp.gt.s32.totalorder %v1314_v17, %v1177_v49  ;;  %vm475_vm10 = vcmp.gt.s32.totalorder %v1329_v21, %v1177_v49  ;;  %v557_v33 = vsel %vm455_vm14, 1, %v827_v30 }
 0x128   : > { %v517_v32 = vadd.f32 %v516_v36, %v486_v15  ;;  %v558_v42 = vsel %vm456_vm15, 1, %v827_v30  ;;  %v559_v43 = vsel %vm457_vm0, 1, %v827_v30  ;;  %vm476_vm11 = vcmp.gt.s32.totalorder %v1332_v22, %v1177_v49 }
 0x129   : > { %vm479_vm12 = vcmp.gt.s32.totalorder %v1363_v29, %v1177_v49  ;;  %v560_v44 = vsel %vm458_vm1, 1, %v827_v30  ;;  %v561_v45 = vsel %vm459_vm2, 1, %v827_v30  ;;  %v562_v46 = vsel %vm460_vm3, 1, %v827_v30 }
 0x12a   : > { %v563_v47 = vsel %vm461_vm6, 1, %v827_v30  ;;  %vm477_vm13 = vcmp.gt.s32.totalorder %v1357_v27, %v1177_v49  ;;  %vm478_vm14 = vcmp.gt.s32.totalorder %v1360_v28, %v1177_v49  ;;  %vm480_vm15 = vcmp.gt.s32.totalorder %v1386_v38, %v1177_v49 }
 0x12b   : > { %vm481_vm0 = vcmp.gt.s32.totalorder %v1389_v39, %v1177_v49  ;;  %v518_v48 = vadd.f32 %v517_v32, %v487_v18  ;;  %v564_v50 = vsel %vm462_vm7, 1, %v827_v30  ;;  %vm1644_vm1 = vcmp.gt.s32.totalorder %v1233_v63, %v1177_v49 }
 0x12c   : > { %v565_v51 = vsel %vm1644_vm1, 1, %v827_v30  ;;  %vm1645_vm2 = vcmp.gt.s32.totalorder %v1236_v0, %v1177_v49  ;;  %vm1646_vm3 = vcmp.gt.s32.totalorder %v1251_v3, %v1177_v49  ;;  %vm1647_vm6 = vcmp.gt.s32.totalorder %v1254_v4, %v1177_v49 }
 0x12d   : > { %v566_v52 = vsel %vm1645_vm2, 1, %v827_v30  ;;  %v567_v53 = vsel %vm1646_vm3, 1, %v827_v30  ;;  %v568_v54 = vsel %vm1647_vm6, 1, %v827_v30  ;;  %v584_v55 = vadd.s32 %v556_v10, %v552_v37 }
 0x12e   : > { %v585_v56 = vadd.s32 %v557_v33, %v553_v31  ;;  %v519_v57 = vadd.f32 %v518_v48, %v488_v19  ;;  %v569_v58 = vsel %vm467_vm4, 1, %v827_v30  ;;  %v586_v59 = vadd.s32 %v558_v42, %v554_v40 }
 0x12f   : > { %v587_v60 = vadd.s32 %v559_v43, %v555_v41  ;;  %vm1648_vm7 = vcmp.gt.s32.totalorder %v1268_v6, %v1177_v49  ;;  %vm1649_vm1 = vcmp.gt.s32.totalorder %v1271_v7, %v1177_v49  ;;  %v588_v1 = vadd.s32 %v584_v55, %v560_v44 }
 0x130   : > { %v570_v61 = vsel %vm1648_vm7, 1, %v827_v30  ;;  %v571_v62 = vsel %vm1649_vm1, 1, %v827_v30  ;;  %v589_v2 = vadd.s32 %v585_v56, %v561_v45  ;;  %v520_v8 = vadd.f32 %v519_v57, %v489_v23 }
 0x131   : > { %vm1650_vm2 = vcmp.gt.s32.totalorder %v1284_v9, %v1177_v49  ;;  %v590_v12 = vadd.s32 %v586_v59, %v562_v46  ;;  %v591_v15 = vadd.s32 %v587_v60, %v563_v47  ;;  %v573_v18 = vsel %vm471_vm5, 1, %v827_v30 }
 0x132   : > { %v572_v11 = vsel %vm1650_vm2, 1, %v827_v30  ;;  %vm1651_vm3 = vcmp.gt.s32.totalorder %v1298_v14, %v1177_v49  ;;  %v592_v20 = vadd.s32 %v588_v1, %v564_v50  ;;  %v593_v36 = vadd.s32 %v589_v2, %v565_v51 }
 0x133   : > { %v574_v19 = vsel %vm1651_vm3, 1, %v827_v30  ;;  %v521_v23 = vadd.f32 %v520_v8, %v490_v24  ;;  %v575_v37 = vsel %vm473_vm8, 1, %v827_v30  ;;  %v594_v31 = vadd.s32 %v590_v12, %v566_v52 }
 0x134   : > { %v595_v40 = vadd.s32 %v591_v15, %v567_v53  ;;  %v576_v41 = vsel %vm474_vm9, 1, %v827_v30  ;;  %v577_v10 = vsel %vm475_vm10, 1, %v827_v30  ;;  %v596_v32 = vadd.s32 %v592_v20, %v568_v54 }
 0x135   : > { %v597_v33 = vadd.s32 %v593_v36, %v569_v58  ;;  %v522_v24 = vadd.f32 %v521_v23, %v1348_v25  ;;  %v578_v42 = vsel %vm476_vm11, 1, %v827_v30  ;;  %v598_v43 = vadd.s32 %v594_v31, %v570_v61 }
 0x136   : > { %v599_v44 = vadd.s32 %v595_v40, %v571_v62  ;;  %v579_v45 = vsel %vm477_vm13, 1, %v827_v30  ;;  %v580_v46 = vsel %vm478_vm14, 1, %v827_v30  ;;  %v600_v47 = vadd.s32 %v596_v32, %v572_v11 }
 0x137   : > { %v601_v48 = vadd.s32 %v597_v33, %v573_v18  ;;  %v523_v25 = vadd.f32 %v522_v24, %v1354_v26  ;;  %v581_v50 = vsel %vm479_vm12, 1, %v827_v30  ;;  %v602_v51 = vadd.s32 %v598_v43, %v574_v19 }
 0x138   : > { %v603_v52 = vadd.s32 %v599_v44, %v575_v37  ;;  %v582_v53 = vsel %vm480_vm15, 1, %v827_v30  ;;  %v583_v54 = vsel %vm481_vm0, 1, %v827_v30  ;;  %v604_v55 = vadd.s32 %v600_v47, %v576_v41 }
 0x139   : > { %v605_v56 = vadd.s32 %v601_v48, %v577_v10  ;;  %v524_v26 = vadd.f32 %v523_v25, %v1373_v34  ;;  %v606_v57 = vadd.s32 %v602_v51, %v578_v42  ;;  %vm1652_vm6 = vcmp.gt.s32.totalorder %v1233_v63, %v1177_v49 }
 0x13a   : > { %v607_v58 = vadd.s32 %v603_v52, %v579_v45  ;;  %v495_v59 = vsel %vm1652_vm6, %v1233_v63, 0.0  ;;  %v608_v60 = vadd.s32 %v604_v55, %v580_v46  ;;  %vm1653_vm7 = vcmp.gt.s32.totalorder %v1236_v0, %v1177_v49 }
 0x13b   : > { %v609_v61 = vadd.s32 %v605_v56, %v581_v50  ;;  %v525_v62 = vadd.f32 %v524_v26, %v1379_v35  ;;  %v610_v1 = vadd.s32 %v606_v57, %v582_v53  ;;  %v496_v30 = vsel %vm1653_vm7, %v1236_v0, 0.0 }
 0x13c   : > { %v611_v2 = vadd.s32 %v607_v58, %v583_v54  ;;  %vm1654_vm1 = vcmp.gt.s32.totalorder %v1251_v3, %v1177_v49  ;;  %vm1655_vm2 = vcmp.gt.s32.totalorder %v1254_v4, %v1177_v49  ;;  %v499_v0 = vsel %vm467_vm4, %v1257_v5, 0.0 }
 0x13d   : > { %v612_v8 = vadd.s32 %v609_v61, %v608_v60  ;;  %v526_v34 = vadd.f32 %v525_v62, %v495_v59  ;;  %v497_v12 = vsel %vm1654_vm1, %v1251_v3, 0.0  ;;  %v498_v35 = vsel %vm1655_vm2, %v1254_v4, 0.0 }
 0x13e   : > { %v613_v11 = vadd.s32 %v611_v2, %v610_v1  ;;  %vm1656_vm3 = vcmp.gt.s32.totalorder %v1268_v6, %v1177_v49  ;;  %vm1657_vm6 = vcmp.gt.s32.totalorder %v1271_v7, %v1177_v49  ;;  %vm1658_vm4 = vcmp.gt.s32.totalorder %v1284_v9, %v1177_v49 }
 0x13f   : > { %v527_v63 = vadd.f32 %v526_v34, %v496_v30  ;;  %v500_v3 = vsel %vm1656_vm3, %v1268_v6, 0.0  ;;  %v501_v4 = vsel %vm1657_vm6, %v1271_v7, 0.0  ;;  %v502_v5 = vsel %vm1658_vm4, %v1284_v9, 0.0 }
 0x140   : > { %v614_v15 = vadd.s32 %v613_v11, %v612_v8  ;;  %v503_v6 = vsel %vm471_vm5, %v1295_v13, 0.0  ;;  %vm1659_vm7 = vcmp.gt.s32.totalorder %v1298_v14, %v1177_v49  ;;  %v505_v9 = vsel %vm473_vm8, %v1311_v16, 0.0 }
 0x141   : > { %v528_v18 = vadd.f32 %v527_v63, %v497_v12  ;;  %v504_v7 = vsel %vm1659_vm7, %v1298_v14, 0.0  ;;  %v506_v13 = vsel %vm474_vm9, %v1314_v17, 0.0  ;;  %v507_v14 = vsel %vm475_vm10, %v1329_v21, 0.0 }
 0x142   : > { %v615_v19 = vrot.slane %v614_v15, 4  ;;  %v508_v45 = vsel %vm476_vm11, %v1332_v22, 0.0  ;;  %v509_v16 = vsel %vm477_vm13, %v1357_v27, 0.0  ;;  %v510_v17 = vsel %vm478_vm14, %v1360_v28, 0.0 }
 0x143   : > { %v529_v20 = vadd.f32 %v528_v18, %v498_v35  ;;  %v511_v48 = vsel %vm479_vm12, %v1363_v29, 0.0  ;;  %v512_v25 = vsel %vm480_vm15, %v1386_v38, 0.0  ;;  %v513_v50 = vsel %vm481_vm0, %v1389_v39, 0.0 }
 0x144   : > { %v616_v36 = vadd.s32 %v615_v19, %v614_v15 }
 0x145   : > { %v530_v23 = vadd.f32 %v529_v20, %v499_v0 }
 0x146   : > { %v617_v37 = vrot.slane %v616_v36, 2 }
 0x147   : > { %v531_v31 = vadd.f32 %v530_v23, %v500_v3 }
 0x148   : > { %v618_v40 = vadd.s32 %v617_v37, %v616_v36 }
 0x149   : > { %v532_v41 = vadd.f32 %v531_v31, %v501_v4 }
 0x14a   : > { %v619_v10 = vrot.slane %v618_v40, 1 }
 0x14b   : > { %v533_v32 = vadd.f32 %v532_v41, %v502_v5 }
 0x14c   : > { %v620_v33 = vadd.s32 %v619_v10, %v618_v40 }
 0x14d   : > { %v534_v24 = vadd.f32 %v533_v32, %v503_v6 }
 0x14e   : > { %622 = vst [vmem:[%s187_s5] sm:$0x1] %v620_v33 }
 0x14f   : > { %v535_v42 = vadd.f32 %v534_v24, %v504_v7 }
 0x151   : > { %v536_v43 = vadd.f32 %v535_v42, %v505_v9 }
 0x153   : > { %v537_v44 = vadd.f32 %v536_v43, %v506_v13 }
 0x155   : > { %v538_v46 = vadd.f32 %v537_v44, %v507_v14 }
 0x157   : > { %v539_v47 = vadd.f32 %v538_v46, %v508_v45 }
 0x159   : > { %v540_v21 = vadd.f32 %v539_v47, %v509_v16 }
 0x15b   : > { %v541_v22 = vadd.f32 %v540_v21, %v510_v17 }
 0x15d   : > { %v542_v27 = vadd.f32 %v541_v22, %v511_v48 }
 0x15f   : > { %v543_v51 = vadd.f32 %v542_v27, %v512_v25 }
 0x161   : > { %v544_v28 = vadd.f32 %v543_v51, %v513_v50 }
 0x163   : > { %v545_v52 = vrot.slane %v544_v28, 4 }
 0x165   : > { %v546_v53 = vadd.f32 %v545_v52, %v544_v28 }
 0x167   : > { %v547_v54 = vrot.slane %v546_v53, 2 }
 0x169   : > { %v548_v55 = vadd.f32 %v547_v54, %v546_v53 }
 0x16b   : > { %v549_v56 = vrot.slane %v548_v55, 1 }
 0x16d   : > { %v550_v29 = vadd.f32 %v549_v56, %v548_v55 }
 0x16f   : > { %621 = vst [vmem:[%s184_s25] sm:$0x1] %v550_v29 }
 0x170 PF: > { %s21_s20 = sadd.s32 1, %s811_s20  }
 0x171   : > { %p18_p11 = scmp.ge.s32.totalorder %s21_s20, 4  }
 0x173   :  { %20 = sbr.rel (!%p18_p11) target bundleno = 16 (0x10), region = 96 }

// kernel: loss_ohem_forward.2
= control target key start
LH: loop header
LB: loop body
LE: loop exit
PB: predicated region body
PF: predicated region fallthrough
CT: control target
= control target key end

     0   :  { %v920_v0 = vmov 0.0   ;;  %v2938_v1 = vmov 0   ;;  %s2928_s6 = inlined_call_operand.vmem [shape: f32[1,128], index: 6, kind: output, shape index: {1}]   ;;  %s2929_s7 = inlined_call_operand.vmem [shape: f32[1,128], index: 7, kind: output, shape index: {2}]   ;;  %s2930_s8 = inlined_call_operand.vmem [shape: s32[1,128], index: 8, kind: output, shape index: {3}]   ;;  %s2931_s9 = inlined_call_operand.vmem [shape: s32[1,128], index: 9, kind: output, shape index: {4}]   ;;  %s2932_s0 = inlined_call_operand.vmem [shape: f32[256,128], index: 0, kind: input, shape index: {}]   ;;  %s2933_s1 = inlined_call_operand.vmem [shape: f32[256,128], index: 1, kind: input, shape index: {}]   ;;  %s2934_s4 = inlined_call_operand.vmem [shape: f32[256,128], index: 4, kind: input, shape index: {}]   ;;  %s2935_s5 = inlined_call_operand.vmem [shape: f32[2,256,128], index: 5, kind: output, shape index: {0}]   ;;  %s2936_s2 = inlined_call_operand.vmem [shape: f32[256,128], index: 2, kind: input, shape index: {}]   ;;  %s2937_s3 = inlined_call_operand.vmem [shape: f32[256,128], index: 3, kind: input, shape index: {}]  }
   0x1   :  { %29 = vst [vmem:[%s2928_s6] sm:$0x1] %v920_v0  ;;  %30 = vst [vmem:[%s2929_s7] sm:$0x1] %v920_v0  ;;  %v989_v2 = vld [vmem:[%s2932_s0] sm:$0xff]  ;;  %v994_v3 = vld [vmem:[%s2932_s0 + $0x8] sm:$0xff] }
   0x2   :  { %31 = vst [vmem:[%s2930_s8] sm:$0x1] %v2938_v1  ;;  %32 = vst [vmem:[%s2931_s9] sm:$0x1] %v2938_v1  ;;  %v999_v4 = vld [vmem:[%s2932_s0 + $0x10] sm:$0xff]  ;;  %v1004_v5 = vld [vmem:[%s2932_s0 + $0x18] sm:$0xff]  ;;  %vm225_vm0 = vcmp.gt.f32.partialorder %v989_v2, 0.1 }
   0x3   :  { %3183 = vst [vmem:[#allocation2_spill] sm:$0xff] %v989_v2  ;;  %3184 = vst [vmem:[#allocation3_spill] sm:$0xff] %v994_v3  ;;  %v1009_v6 = vld [vmem:[%s2932_s0 + $0x20] sm:$0xff]  ;;  %v1014_v7 = vld [vmem:[%s2932_s0 + $0x28] sm:$0xff]  ;;  %vm3028_vm1 = vcmp.gt.f32.partialorder %v994_v3, 0.1 }
   0x4   :  { %3185 = vst [vmem:[#allocation4_spill] sm:$0xff] %v999_v4  ;;  %3186 = vst [vmem:[#allocation5_spill] sm:$0xff] %v1004_v5  ;;  %v1020_v8 = vld [vmem:[%s2932_s0 + $0x30] sm:$0xff]  ;;  %vm3034_vm2 = vcmp.gt.f32.partialorder %v1009_v6, 0.1  ;;  %v330_v9 = vsel %vm225_vm0, 1, %v2938_v1 }
   0x5   :  { %3187 = vst [vmem:[#allocation6_spill] sm:$0xff] %v1009_v6  ;;  %3188 = vst [vmem:[#allocation7_spill] sm:$0xff] %v1014_v7  ;;  %v1030_v10 = vld [vmem:[%s2932_s0 + $0x38] sm:$0xff]  ;;  %vm3031_vm3 = vcmp.gt.f32.partialorder %v999_v4, 0.1  ;;  %v334_v11 = vsel %vm3034_vm2, 1, %v2938_v1 }
   0x6   :  { %3189 = vst [vmem:[#allocation8_spill] sm:$0xff] %v1020_v8  ;;  %3190 = vst [vmem:[#allocation9_spill] sm:$0xff] %v1030_v10  ;;  %vm3045_vm4 = vcmp.gt.f32.partialorder %v1004_v5, 0.1  ;;  %v1040_v12 = vld [vmem:[%s2932_s0 + $0x40] sm:$0xff]  ;;  %v331_v13 = vsel %vm3028_vm1, 1, %v2938_v1  ;;  %v362_v22 = vadd.s32 %v334_v11, %v330_v9 }
   0x7   :  { %3191 = vst [vmem:[#allocation10_spill] sm:$0xff] %v1040_v12  ;;  %vm3037_vm5 = vcmp.gt.f32.partialorder %v1014_v7, 0.1  ;;  %v332_v14 = vsel %vm3031_vm3, 1, %v2938_v1  ;;  %v333_v15 = vsel %vm3045_vm4, 1, %v2938_v1  ;;  %v97_v16 = vld [vmem:[%s2933_s1] sm:$0xff] }
   0x8   :  { %vm3039_vm6 = vcmp.gt.f32.partialorder %v1020_v8, 0.1  ;;  %vm3005_vm7 = vcmp.gt.f32.partialorder %v1030_v10, 0.1  ;;  %v335_v17 = vsel %vm3037_vm5, 1, %v2938_v1  ;;  %v1063_v18 = vld [vmem:[%s2932_s0 + $0x48] sm:$0xff]  ;;  %v129_v32 = vsub.f32 %v989_v2, %v97_v16 }
   0x9   :  { %3192 = vst [vmem:[#allocation11_spill] sm:$0xff] %v1063_v18  ;;  %v98_v19 = vld [vmem:[%s2933_s1 + $0x8] sm:$0xff]  ;;  %vm3004_vm8 = vcmp.gt.f32.partialorder %v1040_v12, 0.1  ;;  %v336_v20 = vsel %vm3039_vm6, 1, %v2938_v1  ;;  %v337_v21 = vsel %vm3005_vm7, 1, %v2938_v1  ;;  %v1110_v33 = vadd.s32 %v335_v17, %v331_v13 }
   0xa   :  { %v1078_v23 = vld [vmem:[%s2932_s0 + $0x50] sm:$0xff]  ;;  %v100_v25 = vld [vmem:[%s2933_s1 + $0x18] sm:$0xff]  ;;  %v338_v26 = vsel %vm3004_vm8, 1, %v2938_v1  ;;  %v1097_v28 = vld [vmem:[%s2932_s0 + $0x60] sm:$0xff]  ;;  %vm3003_vm9 = vcmp.gt.f32.partialorder %v1063_v18, 0.1  ;;  %v130_v40 = vsub.f32 %v994_v3, %v98_v19  ;;  %v1138_v41 = vadd.s32 %v336_v20, %v332_v14 }
   0xb   :  { %3193 = vst [vmem:[#allocation12_spill] sm:$0xff] %v1078_v23  ;;  %v99_v24 = vld [vmem:[%s2933_s1 + $0x10] sm:$0xff]  ;;  %v1092_v27 = vld [vmem:[%s2932_s0 + $0x58] sm:$0xff]  ;;  %3194 = vst [vmem:[#allocation13_spill] sm:$0xff] %v1097_v28  ;;  %vm3002_vm10 = vcmp.gt.f32.partialorder %v1078_v23, 0.1  ;;  %v1140_v42 = vadd.s32 %v337_v21, %v333_v15  ;;  %v1177_v52 = vadd.s32 %v362_v22, %v338_v26  ;;  %v132_v59 = vsub.f32 %v1004_v5, %v100_v25 }
   0xc   :  { %v101_v29 = vld [vmem:[%s2933_s1 + $0x20] sm:$0xff]  ;;  %v102_v30 = vld [vmem:[%s2933_s1 + $0x28] sm:$0xff]  ;;  %v103_v31 = vld [vmem:[%s2933_s1 + $0x30] sm:$0xff]  ;;  %3195 = vst [vmem:[#allocation14_spill] sm:$0xff] %v1110_v33  ;;  %v131_v49 = vsub.f32 %v999_v4, %v99_v24  ;;  %v1170_v50 = vsel %vm3003_vm9, 1, %v2938_v1  ;;  %v1175_v51 = vsel %vm3002_vm10, 1, %v2938_v1  ;;  %v1234_v19 = vmul.f32 %v129_v32, %v129_v32 }
   0xd   :  { %v1115_v34 = vld [vmem:[%s2932_s0 + $0x68] sm:$0xff]  ;;  %v1120_v35 = vld [vmem:[%s2932_s0 + $0x70] sm:$0xff]  ;;  %v1125_v36 = vld [vmem:[%s2932_s0 + $0x78] sm:$0xff]  ;;  %3199 = vst [vmem:[#allocation18_spill] sm:$0xff] %v1138_v41  ;;  %v133_v60 = vsub.f32 %v1009_v6, %v101_v29  ;;  %v134_v61 = vsub.f32 %v1014_v7, %v102_v30  ;;  %v135_v62 = vsub.f32 %v1020_v8, %v103_v31  ;;  %v1263_v32 = vmul.f32 %v130_v40, %v130_v40 }
   0xe   :  { %3196 = vst [vmem:[#allocation15_spill] sm:$0xff] %v1115_v34  ;;  %3197 = vst [vmem:[#allocation16_spill] sm:$0xff] %v1120_v35  ;;  %v104_v37 = vld [vmem:[%s2933_s1 + $0x38] sm:$0xff]  ;;  %v105_v38 = vld [vmem:[%s2933_s1 + $0x40] sm:$0xff] }
   0xf   :  { %3198 = vst [vmem:[#allocation17_spill] sm:$0xff] %v1125_v36  ;;  %v106_v39 = vld [vmem:[%s2933_s1 + $0x48] sm:$0xff]  ;;  %3200 = vst [vmem:[#allocation19_spill] sm:$0xff] %v1140_v42  ;;  %v1145_v43 = vld [vmem:[%s2932_s0 + $0x80] sm:$0xff]  ;;  %v136_v15 = vsub.f32 %v1030_v10, %v104_v37  ;;  %v137_v16 = vsub.f32 %v1040_v12, %v105_v38  ;;  %v1292_v42 = vmul.f32 %v131_v49, %v131_v49 }
  0x10   :  { %3201 = vst [vmem:[#allocation20_spill] sm:$0xff] %v1145_v43  ;;  %v1150_v44 = vld [vmem:[%s2932_s0 + $0x88] sm:$0xff]  ;;  %v1155_v45 = vld [vmem:[%s2932_s0 + $0x90] sm:$0xff]  ;;  %v108_v47 = vld [vmem:[%s2933_s1 + $0x58] sm:$0xff]  ;;  %v138_v17 = vsub.f32 %v1063_v18, %v106_v39  ;;  %v1306_v49 = vmul.f32 %v132_v59, %v132_v59  ;;  %v1320_v59 = vmul.f32 %v133_v60, %v133_v60  ;;  %v167_v41 = vmul.f32 %v135_v62, %v135_v62 }
  0x11   :  { %3202 = vst [vmem:[#allocation21_spill] sm:$0xff] %v1150_v44  ;;  %3203 = vst [vmem:[#allocation22_spill] sm:$0xff] %v1155_v45  ;;  %v107_v46 = vld [vmem:[%s2933_s1 + $0x50] sm:$0xff]  ;;  %v109_v48 = vld [vmem:[%s2933_s1 + $0x60] sm:$0xff]  ;;  %v140_v30 = vsub.f32 %v1092_v27, %v108_v47 }
  0x12   :  { %3204 = vst [vmem:[#allocation23_spill] sm:$0xff] %v1170_v50  ;;  %3205 = vst [vmem:[#allocation24_spill] sm:$0xff] %v1175_v51  ;;  %v1182_v53 = vld [vmem:[%s2932_s0 + $0x98] sm:$0xff]  ;;  %v1187_v54 = vld [vmem:[%s2932_s0 + $0xa0] sm:$0xff]  ;;  %v139_v29 = vsub.f32 %v1078_v23, %v107_v46  ;;  %v141_v31 = vsub.f32 %v1097_v28, %v109_v48 }
  0x13   :  { %3206 = vst [vmem:[#allocation25_spill] sm:$0xff] %v1177_v52  ;;  %3207 = vst [vmem:[#allocation26_spill] sm:$0xff] %v1182_v53  ;;  %v1192_v55 = vld [vmem:[%s2932_s0 + $0xa8] sm:$0xff]  ;;  %v111_v57 = vld [vmem:[%s2933_s1 + $0x70] sm:$0xff] }
  0x14   :  { %3208 = vst [vmem:[#allocation27_spill] sm:$0xff] %v1187_v54  ;;  %3209 = vst [vmem:[#allocation28_spill] sm:$0xff] %v1192_v55  ;;  %v110_v56 = vld [vmem:[%s2933_s1 + $0x68] sm:$0xff]  ;;  %v112_v58 = vld [vmem:[%s2933_s1 + $0x78] sm:$0xff]  ;;  %v143_v1 = vsub.f32 %v1120_v35, %v111_v57 }
  0x15   :  { %v1210_v63 = vld [vmem:[%s2932_s0 + $0xb0] sm:$0xff]  ;;  %v1215_v0 = vld [vmem:[%s2932_s0 + $0xb8] sm:$0xff]  ;;  %v1220_v9 = vld [vmem:[%s2932_s0 + $0xc0] sm:$0xff]  ;;  %v142_v48 = vsub.f32 %v1115_v34, %v110_v56  ;;  %v144_v52 = vsub.f32 %v1125_v36, %v112_v58 }
  0x16   :  { %3210 = vst [vmem:[#allocation29_spill] sm:$0xff] %v1210_v63  ;;  %3211 = vst [vmem:[#allocation30_spill] sm:$0xff] %v1215_v0  ;;  %v113_v11 = vld [vmem:[%s2933_s1 + $0x80] sm:$0xff]  ;;  %v114_v13 = vld [vmem:[%s2933_s1 + $0x88] sm:$0xff] }
  0x17   :  { %3212 = vst [vmem:[#allocation31_spill] sm:$0xff] %v1220_v9  ;;  %v115_v14 = vld [vmem:[%s2933_s1 + $0x90] sm:$0xff]  ;;  %v1239_v20 = vld [vmem:[%s2932_s0 + $0xc8] sm:$0xff]  ;;  %v1249_v22 = vld [vmem:[%s2932_s0 + $0xd8] sm:$0xff]  ;;  %v145_v56 = vsub.f32 %v1145_v43, %v113_v11  ;;  %v146_v57 = vsub.f32 %v1150_v44, %v114_v13 }
  0x18   :  { %3213 = vst [vmem:[#allocation32_spill] sm:$0xff] %v1239_v20  ;;  %v1244_v21 = vld [vmem:[%s2932_s0 + $0xd0] sm:$0xff]  ;;  %3215 = vst [vmem:[#allocation34_spill] sm:$0xff] %v1249_v22  ;;  %v116_v24 = vld [vmem:[%s2933_s1 + $0x98] sm:$0xff]  ;;  %v147_v58 = vsub.f32 %v1155_v45, %v115_v14 }
  0x19   :  { %3214 = vst [vmem:[#allocation33_spill] sm:$0xff] %v1244_v21  ;;  %v117_v25 = vld [vmem:[%s2933_s1 + $0xa0] sm:$0xff]  ;;  %v118_v26 = vld [vmem:[%s2933_s1 + $0xa8] sm:$0xff]  ;;  %v1278_v39 = vld [vmem:[%s2932_s0 + $0xf0] sm:$0xff]  ;;  %v148_v11 = vsub.f32 %v1182_v53, %v116_v24 }
  0x1a   :  { %v1268_v37 = vld [vmem:[%s2932_s0 + $0xe0] sm:$0xff]  ;;  %v1273_v38 = vld [vmem:[%s2932_s0 + $0xe8] sm:$0xff]  ;;  %3218 = vst [vmem:[#allocation37_spill] sm:$0xff] %v1278_v39  ;;  %v119_v40 = vld [vmem:[%s2933_s1 + $0xb0] sm:$0xff]  ;;  %v149_v13 = vsub.f32 %v1187_v54, %v117_v25  ;;  %v150_v14 = vsub.f32 %v1192_v55, %v118_v26  ;;  %v166_v25 = vmul.f32 %v134_v61, %v134_v61  ;;  %v168_v55 = vmul.f32 %v136_v15, %v136_v15 }
  0x1b   :  { %3216 = vst [vmem:[#allocation35_spill] sm:$0xff] %v1268_v37  ;;  %3217 = vst [vmem:[#allocation36_spill] sm:$0xff] %v1273_v38  ;;  %v120_v46 = vld [vmem:[%s2933_s1 + $0xb8] sm:$0xff]  ;;  %v121_v47 = vld [vmem:[%s2933_s1 + $0xc0] sm:$0xff]  ;;  %v151_v4 = vsub.f32 %v1210_v63, %v119_v40 }
  0x1c   :  { %v122_v23 = vld [vmem:[%s2933_s1 + $0xc8] sm:$0xff]  ;;  %v123_v18 = vld [vmem:[%s2933_s1 + $0xd0] sm:$0xff]  ;;  %v124_v12 = vld [vmem:[%s2933_s1 + $0xd8] sm:$0xff]  ;;  %v152_v3 = vsub.f32 %v1215_v0, %v120_v46  ;;  %v153_v24 = vsub.f32 %v1220_v9, %v121_v47  ;;  %v169_v46 = vmul.f32 %v137_v16, %v137_v16  ;;  %v170_v0 = vmul.f32 %v138_v17, %v138_v17 }
  0x1d   :  { %v125_v10 = vld [vmem:[%s2933_s1 + $0xe0] sm:$0xff]  ;;  %v126_v8 = vld [vmem:[%s2933_s1 + $0xe8] sm:$0xff]  ;;  %v127_v7 = vld [vmem:[%s2933_s1 + $0xf0] sm:$0xff]  ;;  %v154_v26 = vsub.f32 %v1239_v20, %v122_v23  ;;  %v155_v60 = vsub.f32 %v1244_v21, %v123_v18  ;;  %v156_v2 = vsub.f32 %v1249_v22, %v124_v12  ;;  %v171_v47 = vmul.f32 %v139_v29, %v139_v29 }
  0x1e   :  { %v1325_v6 = vld [vmem:[%s2932_s0 + $0xf8] sm:$0xff]  ;;  %v157_v51 = vsub.f32 %v1268_v37, %v125_v10  ;;  %v158_v33 = vsub.f32 %v1273_v38, %v126_v8  ;;  %v159_v50 = vsub.f32 %v1278_v39, %v127_v7  ;;  %v1343_v23 = vld [vmem:[%s2934_s4] sm:$0xff]  ;;  %v1348_v12 = vld [vmem:[%s2934_s4 + $0x8] sm:$0xff]  ;;  %v172_v8 = vmul.f32 %v140_v30, %v140_v30 }
  0x1f   :  { %3219 = vst [vmem:[#allocation38_spill] sm:$0xff] %v1325_v6  ;;  %v128_v5 = vld [vmem:[%s2933_s1 + $0xf8] sm:$0xff]  ;;  %3220 = vst [vmem:[#allocation39_spill] sm:$0xff] %v1343_v23  ;;  %v1353_v7 = vld [vmem:[%s2934_s4 + $0x10] sm:$0xff]  ;;  %v174_v10 = vmul.f32 %v142_v48, %v142_v48  ;;  %v175_v18 = vmul.f32 %v143_v1, %v143_v1  ;;  %v176_v16 = vmul.f32 %v144_v52, %v144_v52 }
  0x20   :  { %v160_v40 = vsub.f32 %v1325_v6, %v128_v5  ;;  %3221 = vst [vmem:[#allocation40_spill] sm:$0xff] %v1348_v12  ;;  %3222 = vst [vmem:[#allocation41_spill] sm:$0xff] %v1353_v7  ;;  %v173_v5 = vmul.f32 %v141_v31, %v141_v31  ;;  %v1358_v61 = vld [vmem:[%s2934_s4 + $0x18] sm:$0xff]  ;;  %v1363_v62 = vld [vmem:[%s2934_s4 + $0x20] sm:$0xff]  ;;  %v177_v17 = vmul.f32 %v145_v56, %v145_v56 }
  0x21   :  { %3223 = vst [vmem:[#allocation42_spill] sm:$0xff] %v1358_v61  ;;  %3224 = vst [vmem:[#allocation43_spill] sm:$0xff] %v1363_v62  ;;  %v1368_v15 = vld [vmem:[%s2934_s4 + $0x28] sm:$0xff]  ;;  %v178_v29 = vmul.f32 %v146_v57, %v146_v57  ;;  %v179_v30 = vmul.f32 %v147_v58, %v147_v58  ;;  %v1373_v1 = vld [vmem:[%s2934_s4 + $0x30] sm:$0xff]  ;;  %v180_v6 = vmul.f32 %v148_v11, %v148_v11 }
  0x22   :  { %3225 = vst [vmem:[#allocation44_spill] sm:$0xff] %v1368_v15  ;;  %3226 = vst [vmem:[#allocation45_spill] sm:$0xff] %v1373_v1  ;;  %v1378_v31 = vld [vmem:[%s2934_s4 + $0x38] sm:$0xff]  ;;  %v1383_v48 = vld [vmem:[%s2934_s4 + $0x40] sm:$0xff]  ;;  %v181_v52 = vmul.f32 %v149_v13, %v149_v13  ;;  %v182_v56 = vmul.f32 %v150_v14, %v150_v14  ;;  %v183_v57 = vmul.f32 %v151_v4, %v151_v4 }
  0x23   :  { %3227 = vst [vmem:[#allocation46_spill] sm:$0xff] %v1378_v31  ;;  %3228 = vst [vmem:[#allocation47_spill] sm:$0xff] %v1383_v48  ;;  %v1388_v58 = vld [vmem:[%s2934_s4 + $0x48] sm:$0xff]  ;;  %v1393_v39 = vld [vmem:[%s2934_s4 + $0x50] sm:$0xff]  ;;  %v184_v38 = vmul.f32 %v152_v3, %v152_v3  ;;  %v185_v11 = vmul.f32 %v153_v24, %v153_v24  ;;  %v186_v13 = vmul.f32 %v154_v26, %v154_v26 }
  0x24   :  { %3229 = vst [vmem:[#allocation48_spill] sm:$0xff] %v1388_v58  ;;  %3230 = vst [vmem:[#allocation49_spill] sm:$0xff] %v1393_v39  ;;  %v1398_v37 = vld [vmem:[%s2934_s4 + $0x58] sm:$0xff]  ;;  %v187_v14 = vmul.f32 %v155_v60, %v155_v60  ;;  %v1403_v4 = vld [vmem:[%s2934_s4 + $0x60] sm:$0xff]  ;;  %v188_v20 = vmul.f32 %v156_v2, %v156_v2  ;;  %v189_v3 = vmul.f32 %v157_v51, %v157_v51 }
  0x25   :  { %3231 = vst [vmem:[#allocation50_spill] sm:$0xff] %v1398_v37  ;;  %3232 = vst [vmem:[#allocation51_spill] sm:$0xff] %v1403_v4  ;;  %v1408_v22 = vld [vmem:[%s2934_s4 + $0x68] sm:$0xff]  ;;  %v1413_v21 = vld [vmem:[%s2934_s4 + $0x70] sm:$0xff]  ;;  %v190_v24 = vmul.f32 %v158_v33, %v158_v33  ;;  %v191_v26 = vmul.f32 %v159_v50, %v159_v50  ;;  %v192_v54 = vmul.f32 %v160_v40, %v160_v40 }
  0x26   :  { %3233 = vst [vmem:[#allocation52_spill] sm:$0xff] %v1408_v22  ;;  %3234 = vst [vmem:[#allocation53_spill] sm:$0xff] %v1413_v21  ;;  %v1418_v60 = vld [vmem:[%s2934_s4 + $0x78] sm:$0xff]  ;;  %v1423_v9 = vld [vmem:[%s2934_s4 + $0x80] sm:$0xff]  ;;  %v1432_v2 = vmul.f32 %v1234_v19, %v1343_v23  ;;  %v1436_v33 = vmul.f32 %v1263_v32, %v1348_v12  ;;  %v1440_v50 = vmul.f32 %v1292_v42, %v1353_v7 }
  0x27   :  { %3235 = vst [vmem:[#allocation54_spill] sm:$0xff] %v1418_v60  ;;  %3236 = vst [vmem:[#allocation55_spill] sm:$0xff] %v1423_v9  ;;  %v1428_v63 = vld [vmem:[%s2934_s4 + $0x88] sm:$0xff]  ;;  %v1445_v51 = vld [vmem:[%s2934_s4 + $0x90] sm:$0xff]  ;;  %v1459_v32 = vmul.f32 %v1306_v49, %v1358_v61  ;;  %v1463_v42 = vmul.f32 %v1320_v59, %v1363_v62  ;;  %v1466_v7 = vmul.f32 %v166_v25, %v1368_v15 }
  0x28   :  { %3237 = vst [vmem:[#allocation56_spill] sm:$0xff] %v1428_v63  ;;  %3238 = vst [vmem:[#allocation57_spill] sm:$0xff] %v1445_v51  ;;  %v1450_v40 = vld [vmem:[%s2934_s4 + $0x98] sm:$0xff]  ;;  %v1455_v19 = vld [vmem:[%s2934_s4 + $0xa0] sm:$0xff]  ;;  %v1469_v12 = vmul.f32 %v167_v41, %v1373_v1  ;;  %v1487_v25 = vmul.f32 %v168_v55, %v1378_v31  ;;  %v1490_v41 = vmul.f32 %v169_v46, %v1383_v48 }
  0x29   :  { %3239 = vst [vmem:[#allocation58_spill] sm:$0xff] %v1450_v40  ;;  %3240 = vst [vmem:[#allocation59_spill] sm:$0xff] %v1455_v19  ;;  %v1474_v23 = vld [vmem:[%s2934_s4 + $0xa8] sm:$0xff]  ;;  %v1479_v49 = vld [vmem:[%s2934_s4 + $0xb0] sm:$0xff]  ;;  %v1493_v1 = vmul.f32 %v170_v0, %v1388_v58  ;;  %v1496_v15 = vmul.f32 %v171_v47, %v1393_v39  ;;  %v1514_v0 = vmul.f32 %v172_v8, %v1398_v37  ;;  %v260_v37 = vsel %vm3031_vm3, %v1440_v50, 0.0 }
  0x2a   :  { %3241 = vst [vmem:[#allocation60_spill] sm:$0xff] %v1474_v23  ;;  %3242 = vst [vmem:[#allocation61_spill] sm:$0xff] %v1479_v49  ;;  %v1484_v59 = vld [vmem:[%s2934_s4 + $0xb8] sm:$0xff]  ;;  %v1501_v62 = vld [vmem:[%s2934_s4 + $0xc0] sm:$0xff]  ;;  %v1517_v46 = vmul.f32 %v173_v5, %v1403_v4  ;;  %v1520_v47 = vmul.f32 %v174_v10, %v1408_v22  ;;  %v1523_v39 = vmul.f32 %v175_v18, %v1413_v21 }
  0x2b   :  { %3243 = vst [vmem:[#allocation62_spill] sm:$0xff] %v1484_v59  ;;  %3244 = vst [vmem:[#allocation63_spill] sm:$0xff] %v1501_v62  ;;  %v1506_v61 = vld [vmem:[%s2934_s4 + $0xc8] sm:$0xff]  ;;  %v1511_v55 = vld [vmem:[%s2934_s4 + $0xd0] sm:$0xff]  ;;  %v1541_v5 = vmul.f32 %v176_v16, %v1418_v60  ;;  %v1544_v10 = vmul.f32 %v177_v17, %v1423_v9  ;;  %v1547_v18 = vmul.f32 %v178_v29, %v1428_v63  ;;  %v259_v60 = vsel %vm3028_vm1, %v1436_v33, 0.0 }
  0x2c   :  { %3245 = vst [vmem:[#allocation64_spill] sm:$0xff] %v1506_v61  ;;  %3246 = vst [vmem:[#allocation65_spill] sm:$0xff] %v1511_v55  ;;  %v1528_v58 = vld [vmem:[%s2934_s4 + $0xd8] sm:$0xff]  ;;  %v1533_v48 = vld [vmem:[%s2934_s4 + $0xe0] sm:$0xff]  ;;  %v1550_v21 = vmul.f32 %v179_v30, %v1445_v51  ;;  %v1560_v16 = vmul.f32 %v180_v6, %v1450_v40  ;;  %v1563_v17 = vmul.f32 %v181_v52, %v1455_v19 }
  0x2d   :  { %3247 = vst [vmem:[#allocation66_spill] sm:$0xff] %v1517_v46  ;;  %3248 = vst [vmem:[#allocation67_spill] sm:$0xff] %v1520_v47  ;;  %v1538_v8 = vld [vmem:[%s2934_s4 + $0xe8] sm:$0xff]  ;;  %v1557_v22 = vld [vmem:[%s2934_s4 + $0xf0] sm:$0xff]  ;;  %v1566_v29 = vmul.f32 %v182_v56, %v1474_v23  ;;  %v1569_v30 = vmul.f32 %v183_v57, %v1479_v49  ;;  %v1577_v63 = vmul.f32 %v184_v38, %v1484_v59 }
  0x2e   :  { %3249 = vst [vmem:[#allocation68_spill] sm:$0xff] %v1523_v39  ;;  %3250 = vst [vmem:[#allocation69_spill] sm:$0xff] %v1528_v58  ;;  %v1574_v51 = vld [vmem:[%s2934_s4 + $0xf8] sm:$0xff]  ;;  %v1580_v6 = vmul.f32 %v185_v11, %v1501_v62  ;;  %v1583_v52 = vmul.f32 %v186_v13, %v1506_v61  ;;  %v1586_v56 = vmul.f32 %v187_v14, %v1511_v55  ;;  %v3272_v11 = vld [vmem:[#allocation27_spill] sm:$0xff] }
  0x2f   :  { %3251 = vst [vmem:[#allocation70_spill] sm:$0xff] %v1533_v48  ;;  %3252 = vst [vmem:[#allocation71_spill] sm:$0xff] %v1538_v8  ;;  %v1589_v57 = vmul.f32 %v188_v20, %v1528_v58  ;;  %v1592_v49 = vmul.f32 %v189_v3, %v1533_v48  ;;  %v1595_v23 = vmul.f32 %v190_v24, %v1538_v8  ;;  %vm245_vm13 = vcmp.gt.f32.partialorder %v3272_v11, 0.1  ;;  %v3273_v13 = vld [vmem:[#allocation28_spill] sm:$0xff]  ;;  %v3274_v14 = vld [vmem:[#allocation29_spill] sm:$0xff] }
  0x30   :  { %3253 = vst [vmem:[#allocation72_spill] sm:$0xff] %v1541_v5  ;;  %3254 = vst [vmem:[#allocation73_spill] sm:$0xff] %v1544_v10  ;;  %v1599_v38 = vmul.f32 %v191_v26, %v1557_v22  ;;  %v1606_v20 = vmul.f32 %v192_v54, %v1574_v51  ;;  %vm246_vm8 = vcmp.gt.f32.partialorder %v3273_v13, 0.1  ;;  %v3275_v3 = vld [vmem:[#allocation30_spill] sm:$0xff]  ;;  %v3276_v24 = vld [vmem:[#allocation31_spill] sm:$0xff] }
  0x31   :  { %3255 = vst [vmem:[#allocation74_spill] sm:$0xff] %v1547_v18  ;;  %3256 = vst [vmem:[#allocation75_spill] sm:$0xff] %v1550_v21  ;;  %v3277_v26 = vld [vmem:[#allocation23_spill] sm:$0xff]  ;;  %v3279_v48 = vld [vmem:[#allocation32_spill] sm:$0xff] }
  0x32   :  { %3257 = vst [vmem:[#allocation76_spill] sm:$0xff] %v1557_v22  ;;  %3258 = vst [vmem:[#allocation77_spill] sm:$0xff] %v1560_v16  ;;  %v3278_v22 = vld [vmem:[#allocation14_spill] sm:$0xff]  ;;  %vm250_vm11 = vcmp.gt.f32.partialorder %v3279_v48, 0.1  ;;  %v3280_v54 = vld [vmem:[#allocation33_spill] sm:$0xff] }
  0x33   :  { %3259 = vst [vmem:[#allocation78_spill] sm:$0xff] %v1563_v17  ;;  %3260 = vst [vmem:[#allocation79_spill] sm:$0xff] %v1566_v29  ;;  %v367_v8 = vadd.s32 %v3278_v22, %v3277_v26  ;;  %vm251_vm12 = vcmp.gt.f32.partialorder %v3280_v54, 0.1  ;;  %v3282_v58 = vld [vmem:[#allocation36_spill] sm:$0xff]  ;;  %v3284_v61 = vld [vmem:[#allocation18_spill] sm:$0xff] }
  0x34   :  { %3261 = vst [vmem:[#allocation80_spill] sm:$0xff] %v1569_v30  ;;  %3262 = vst [vmem:[#allocation81_spill] sm:$0xff] %v1574_v51  ;;  %v3281_v51 = vld [vmem:[#allocation34_spill] sm:$0xff]  ;;  %vm254_vm9 = vcmp.gt.f32.partialorder %v3282_v58, 0.1  ;;  %v3283_v55 = vld [vmem:[#allocation24_spill] sm:$0xff] }
  0x35   :  { %3263 = vst [vmem:[#allocation82_spill] sm:$0xff] %v1577_v63  ;;  %3264 = vst [vmem:[#allocation83_spill] sm:$0xff] %v1580_v6  ;;  %vm252_vm10 = vcmp.gt.f32.partialorder %v3281_v51, 0.1  ;;  %v368_v62 = vadd.s32 %v3284_v61, %v3283_v55  ;;  %v3285_v59 = vld [vmem:[#allocation35_spill] sm:$0xff]  ;;  %v3286_v19 = vld [vmem:[#allocation37_spill] sm:$0xff] }
  0x36   :  { %3265 = vst [vmem:[#allocation84_spill] sm:$0xff] %v1583_v52  ;;  %3266 = vst [vmem:[#allocation85_spill] sm:$0xff] %v1586_v56  ;;  %vm253_vm7 = vcmp.gt.f32.partialorder %v3285_v59, 0.1  ;;  %vm255_vm14 = vcmp.gt.f32.partialorder %v3286_v19, 0.1 }
  0x37   :  { %3267 = vst [vmem:[#allocation86_spill] sm:$0xff] %v1589_v57  ;;  %3268 = vst [vmem:[#allocation87_spill] sm:$0xff] %v1592_v49  ;;  %v3287_v40 = vld [vmem:[#allocation38_spill] sm:$0xff]  ;;  %v258_v22 = vsel %vm225_vm0, %v1432_v2, 0.0  ;;  %v3289_v26 = vld [vmem:[#allocation3_spill] sm:$0xff]  ;;  %v261_v55 = vsel %vm3045_vm4, %v1459_v32, 0.0 }
  0x38   :  { %3269 = vst [vmem:[#allocation88_spill] sm:$0xff] %v1595_v23  ;;  %3270 = vst [vmem:[#allocation89_spill] sm:$0xff] %v1599_v38  ;;  %vm256_vm15 = vcmp.gt.f32.partialorder %v3287_v40, 0.1  ;;  %v3290_v4 = vld [vmem:[#allocation4_spill] sm:$0xff]  ;;  %v3291_v61 = vld [vmem:[#allocation5_spill] sm:$0xff]  ;;  %v290_v5 = vadd.f32 %v259_v60, %v258_v22 }
  0x39   :  { %3271 = vst [vmem:[#allocation90_spill] sm:$0xff] %v1606_v20  ;;  %v3292_v31 = vld [vmem:[#allocation6_spill] sm:$0xff]  ;;  %v262_v20 = vsel %vm3034_vm2, %v1463_v42, 0.0  ;;  %v3293_v38 = vld [vmem:[#allocation7_spill] sm:$0xff]  ;;  %v263_v23 = vsel %vm3037_vm5, %v1466_v7, 0.0  ;;  %v3294_v49 = vld [vmem:[#allocation8_spill] sm:$0xff] }
  0x3a   :  { %v264_v57 = vsel %vm3039_vm6, %v1469_v12, 0.0  ;;  %v3295_v56 = vld [vmem:[#allocation9_spill] sm:$0xff]  ;;  %v3297_v6 = vld [vmem:[#allocation10_spill] sm:$0xff]  ;;  %v3299_v30 = vld [vmem:[#allocation11_spill] sm:$0xff]  ;;  %vm3305_vm6 = vcmp.gt.f32.partialorder %v1092_v27, 0.1 }
  0x3b   :  { %vm3296_vm1 = vcmp.gt.f32.partialorder %v3295_v56, 0.1  ;;  %vm3298_vm3 = vcmp.gt.f32.partialorder %v3297_v6, 0.1  ;;  %vm3300_vm2 = vcmp.gt.f32.partialorder %v3299_v30, 0.1 }
  0x3c   :  { %v265_v52 = vsel %vm3296_vm1, %v1487_v25, 0.0  ;;  %v1653_v63 = vsel %vm3298_vm3, %v1490_v41, 0.0  ;;  %v1658_v29 = vsel %vm3300_vm2, %v1493_v1, 0.0  ;;  %v3302_v17 = vld [vmem:[#allocation12_spill] sm:$0xff]  ;;  %v1668_v21 = vsel %vm3305_vm6, %v1514_v0, 0.0  ;;  %vm3312_vm2 = vmmov %vm3305_vm6 }
  0x3d   :  { %3301 = vst [vmem:[#allocation23_spill] sm:$0xff] %v1658_v29  ;;  %vm3303_vm5 = vcmp.gt.f32.partialorder %v3302_v17, 0.1  ;;  %3306 = vst [vmem:[#allocation24_spill] sm:$0xff] %v1668_v21  ;;  %vm3307_vm1 = vcmp.gt.f32.partialorder %v1097_v28, 0.1 }
  0x3e   :  { %v1663_v16 = vsel %vm3303_vm5, %v1496_v15, 0.0  ;;  %v1673_v18 = vsel %vm3307_vm1, %v1517_v46, 0.0  ;;  %vm3309_vm3 = vcmp.gt.f32.partialorder %v1115_v34, 0.1  ;;  %v3311_v29 = vmov 0   ;;  %vm3313_vm5 = vmmov %vm3307_vm1 }
  0x3f   :  { %3304 = vst [vmem:[#allocation14_spill] sm:$0xff] %v1663_v16  ;;  %3308 = vst [vmem:[#allocation18_spill] sm:$0xff] %v1673_v18  ;;  %v1678_v10 = vsel %vm3309_vm3, %v1520_v47, 0.0  ;;  %v341_v16 = vsel %vm3312_vm2, 1, %v3311_v29  ;;  %v342_v39 = vsel %vm3313_vm5, 1, %v3311_v29  ;;  %v291_v47 = vadd.f32 %v290_v5, %v260_v37 }
  0x40   :  { %3310 = vst [vmem:[#allocation2_spill] sm:$0xff] %v1678_v10  ;;  %vm3314_vm6 = vmmov %vm3309_vm3  ;;  %vm3315_vm1 = vcmp.gt.f32.partialorder %v1120_v35, 0.1  ;;  %vm3316_vm3 = vcmp.gt.f32.partialorder %v1125_v36, 0.1  ;;  %v350_v36 = vsel %vm245_vm13, 1, %v3311_v29 }
  0x41   :  { %v343_v21 = vsel %vm3314_vm6, 1, %v3311_v29  ;;  %v344_v18 = vsel %vm3315_vm1, 1, %v3311_v29  ;;  %v345_v60 = vsel %vm3316_vm3, 1, %v3311_v29  ;;  %vm3317_vm4 = vcmp.gt.f32.partialorder %v1145_v43, 0.1 }
  0x42   :  { %v346_v22 = vsel %vm3317_vm4, 1, %v3311_v29  ;;  %vm3318_vm2 = vcmp.gt.f32.partialorder %v1150_v44, 0.1  ;;  %vm3319_vm5 = vcmp.gt.f32.partialorder %v1155_v45, 0.1  ;;  %v351_v43 = vsel %vm246_vm8, 1, %v3311_v29 }
  0x43   :  { %v347_v10 = vsel %vm3318_vm2, 1, %v3311_v29  ;;  %v348_v34 = vsel %vm3319_vm5, 1, %v3311_v29  ;;  %vm3320_vm6 = vcmp.gt.f32.partialorder %v1182_v53, 0.1  ;;  %vm3321_vm4 = vcmp.gt.f32.partialorder %v3274_v14, 0.1 }
  0x44   :  { %v349_v35 = vsel %vm3320_vm6, 1, %v3311_v29  ;;  %v352_v37 = vsel %vm3321_vm4, 1, %v3311_v29  ;;  %vm3322_vm1 = vcmp.gt.f32.partialorder %v3275_v3, 0.1  ;;  %vm3323_vm3 = vcmp.gt.f32.partialorder %v3276_v24, 0.1 }
  0x45   :  { %v353_v5 = vsel %vm3322_vm1, 1, %v3311_v29  ;;  %v354_v53 = vsel %vm3323_vm3, 1, %v3311_v29  ;;  %v292_v45 = vadd.f32 %v291_v47, %v261_v55  ;;  %v355_v11 = vsel %vm250_vm11, 1, %v3311_v29  ;;  %v3324_v24 = vld [vmem:[#allocation19_spill] sm:$0xff]  ;;  %v3325_v44 = vld [vmem:[#allocation25_spill] sm:$0xff] }
  0x46   :  { %v356_v13 = vsel %vm251_vm12, 1, %v3311_v29  ;;  %v357_v14 = vsel %vm252_vm10, 1, %v3311_v29  ;;  %v358_v3 = vsel %vm253_vm7, 1, %v3311_v29  ;;  %v359_v47 = vsel %vm254_vm9, 1, %v3311_v29 }
  0x47   :  { %v360_v55 = vsel %vm255_vm14, 1, %v3311_v29  ;;  %v361_v54 = vsel %vm256_vm15, 1, %v3311_v29  ;;  %v293_v48 = vadd.f32 %v292_v45, %v262_v20  ;;  %v369_v51 = vadd.s32 %v3324_v24, %v341_v16  ;;  %v3360_v24 = vld [vmem:[#allocation26_spill] sm:$0xff] }
  0x48   :  { %v370_v28 = vadd.s32 %v3325_v44, %v342_v39  ;;  %v371_v46 = vadd.s32 %v367_v8, %v343_v21  ;;  %v372_v59 = vadd.s32 %v368_v62, %v344_v18  ;;  %v401_v58 = vsel %vm225_vm0, 0.0, %v1432_v2  ;;  %v3347_v18 = vld [vmem:[#allocation72_spill] sm:$0xff] }
  0x49   :  { %vm3326_vm2 = vcmp.gt.f32.partialorder %v3289_v26, 0.1  ;;  %vm3327_vm5 = vcmp.gt.f32.partialorder %v3290_v4, 0.1  ;;  %v294_v29 = vadd.f32 %v293_v48, %v263_v23  ;;  %v373_v45 = vadd.s32 %v369_v51, %v345_v60  ;;  %433 = vst [vmem:[%s2935_s5] sm:$0xff] %v401_v58  ;;  %v3362_v26 = vld [vmem:[#allocation14_spill] sm:$0xff] }
  0x4a   :  { %v402_v19 = vsel %vm3326_vm2, 0.0, %v1436_v33  ;;  %v403_v40 = vsel %vm3327_vm5, 0.0, %v1440_v50  ;;  %v374_v20 = vadd.s32 %v370_v28, %v346_v22  ;;  %v375_v16 = vadd.s32 %v371_v46, %v347_v10  ;;  %v3363_v22 = vld [vmem:[#allocation78_spill] sm:$0xff] }
  0x4b   :  { %434 = vst [vmem:[%s2935_s5 + $0x8] sm:$0xff] %v402_v19  ;;  %435 = vst [vmem:[%s2935_s5 + $0x10] sm:$0xff] %v403_v40  ;;  %v376_v44 = vadd.s32 %v372_v59, %v348_v34  ;;  %vm3328_vm0 = vcmp.gt.f32.partialorder %v3291_v61, 0.1  ;;  %vm3329_vm6 = vcmp.gt.f32.partialorder %v3292_v31, 0.1  ;;  %v295_v39 = vadd.f32 %v294_v29, %v264_v57 }
  0x4c   :  { %v404_v9 = vsel %vm3328_vm0, 0.0, %v1459_v32  ;;  %v405_v28 = vsel %vm3329_vm6, 0.0, %v1463_v42  ;;  %vm3330_vm4 = vcmp.gt.f32.partialorder %v3293_v38, 0.1  ;;  %v377_v23 = vadd.s32 %v373_v45, %v349_v35  ;;  %v3340_v32 = vld [vmem:[#allocation67_spill] sm:$0xff]  ;;  %v3343_v59 = vld [vmem:[#allocation68_spill] sm:$0xff] }
  0x4d   :  { %v406_v21 = vsel %vm3330_vm4, 0.0, %v1466_v7  ;;  %v378_v62 = vadd.s32 %v374_v20, %v350_v36  ;;  %v379_v48 = vadd.s32 %v375_v16, %v351_v43  ;;  %436 = vst [vmem:[%s2935_s5 + $0x18] sm:$0xff] %v404_v9  ;;  %437 = vst [vmem:[%s2935_s5 + $0x20] sm:$0xff] %v405_v28  ;;  %v380_v34 = vadd.s32 %v376_v44, %v352_v37  ;;  %v3341_v42 = vld [vmem:[#allocation15_spill] sm:$0xff]  ;;  %v3354_v57 = vld [vmem:[#allocation21_spill] sm:$0xff] }
  0x4e   :  { %438 = vst [vmem:[%s2935_s5 + $0x28] sm:$0xff] %v406_v21  ;;  %vm3331_vm1 = vcmp.gt.f32.partialorder %v3294_v49, 0.1  ;;  %vm3332_vm3 = vcmp.gt.f32.partialorder %v3295_v56, 0.1  ;;  %v296_v43 = vadd.f32 %v295_v39, %v265_v52  ;;  %v381_v31 = vadd.s32 %v377_v23, %v353_v5  ;;  %v3353_v56 = vld [vmem:[#allocation74_spill] sm:$0xff] }
  0x4f   :  { %v407_v7 = vsel %vm3331_vm1, 0.0, %v1469_v12  ;;  %v408_v35 = vsel %vm3332_vm3, 0.0, %v1487_v25  ;;  %vm3333_vm2 = vcmp.gt.f32.partialorder %v3297_v6, 0.1  ;;  %v382_v58 = vadd.s32 %v378_v62, %v354_v53  ;;  %v3344_v25 = vld [vmem:[#allocation16_spill] sm:$0xff]  ;;  %v3368_v16 = vld [vmem:[#allocation29_spill] sm:$0xff] }
  0x50   :  { %v409_v36 = vsel %vm3333_vm2, 0.0, %v1490_v41  ;;  %v383_v4 = vadd.s32 %v379_v48, %v355_v11  ;;  %439 = vst [vmem:[%s2935_s5 + $0x30] sm:$0xff] %v407_v7  ;;  %440 = vst [vmem:[%s2935_s5 + $0x38] sm:$0xff] %v408_v35  ;;  %v384_v12 = vadd.s32 %v380_v34, %v356_v13  ;;  %vm3334_vm5 = vcmp.gt.f32.partialorder %v3299_v30, 0.1  ;;  %v3350_v30 = vld [vmem:[#allocation73_spill] sm:$0xff] }
  0x51   :  { %441 = vst [vmem:[%s2935_s5 + $0x40] sm:$0xff] %v409_v36  ;;  %v410_v2 = vsel %vm3334_vm5, 0.0, %v1493_v1  ;;  %vm3335_vm0 = vcmp.gt.f32.partialorder %v3302_v17, 0.1  ;;  %vm3336_vm6 = vcmp.gt.f32.partialorder %v1092_v27, 0.1  ;;  %v297_v50 = vadd.f32 %v296_v43, %v1653_v63 }
  0x52   :  { %v411_v53 = vsel %vm3335_vm0, 0.0, %v1496_v15  ;;  %v412_v33 = vsel %vm3336_vm6, 0.0, %v1514_v0  ;;  %v385_v51 = vadd.s32 %v381_v31, %v357_v14  ;;  %v386_v40 = vadd.s32 %v382_v58, %v358_v3  ;;  %442 = vst [vmem:[%s2935_s5 + $0x48] sm:$0xff] %v410_v2  ;;  %v3337_v27 = vld [vmem:[#allocation66_spill] sm:$0xff]  ;;  %v3338_v1 = vld [vmem:[#allocation13_spill] sm:$0xff]  ;;  %v3346_v0 = vld [vmem:[#allocation23_spill] sm:$0xff] }
  0x53   :  { %v387_v19 = vadd.s32 %v383_v4, %v359_v47  ;;  %443 = vst [vmem:[%s2935_s5 + $0x50] sm:$0xff] %v411_v53  ;;  %444 = vst [vmem:[%s2935_s5 + $0x58] sm:$0xff] %v412_v33  ;;  %v388_v15 = vadd.s32 %v384_v12, %v360_v55  ;;  %vm3339_vm4 = vcmp.gt.f32.partialorder %v3338_v1, 0.1  ;;  %vm3342_vm1 = vcmp.gt.f32.partialorder %v3341_v42, 0.1 }
  0x54   :  { %v413_v63 = vsel %vm3339_vm4, 0.0, %v3337_v27  ;;  %v414_v49 = vsel %vm3342_vm1, 0.0, %v3340_v32  ;;  %vm3345_vm3 = vcmp.gt.f32.partialorder %v3344_v25, 0.1  ;;  %v298_v46 = vadd.f32 %v297_v50, %v3346_v0  ;;  %v3348_v17 = vld [vmem:[#allocation17_spill] sm:$0xff]  ;;  %v3351_v6 = vld [vmem:[#allocation20_spill] sm:$0xff] }
  0x55   :  { %v415_v41 = vsel %vm3345_vm3, 0.0, %v3343_v59  ;;  %v389_v8 = vadd.s32 %v385_v51, %v361_v54  ;;  %v390_v10 = vadd.s32 %v387_v19, %v386_v40  ;;  %445 = vst [vmem:[%s2935_s5 + $0x60] sm:$0xff] %v413_v63  ;;  %446 = vst [vmem:[%s2935_s5 + $0x68] sm:$0xff] %v414_v49  ;;  %vm3349_vm2 = vcmp.gt.f32.partialorder %v3348_v17, 0.1  ;;  %v3356_v11 = vld [vmem:[#allocation75_spill] sm:$0xff] }
  0x56   :  { %447 = vst [vmem:[%s2935_s5 + $0x70] sm:$0xff] %v415_v41  ;;  %v416_v29 = vsel %vm3349_vm2, 0.0, %v3347_v18  ;;  %vm3352_vm5 = vcmp.gt.f32.partialorder %v3351_v6, 0.1  ;;  %vm3355_vm0 = vcmp.gt.f32.partialorder %v3354_v57, 0.1  ;;  %v299_v61 = vadd.f32 %v298_v46, %v3362_v26 }
  0x57   :  { %448 = vst [vmem:[%s2935_s5 + $0x78] sm:$0xff] %v416_v29  ;;  %v417_v52 = vsel %vm3352_vm5, 0.0, %v3350_v30  ;;  %v418_v38 = vsel %vm3355_vm0, 0.0, %v3353_v56  ;;  %v3357_v13 = vld [vmem:[#allocation22_spill] sm:$0xff]  ;;  %v3359_v3 = vld [vmem:[#allocation77_spill] sm:$0xff]  ;;  %v391_v60 = vadd.s32 %v389_v8, %v388_v15  ;;  %v421_v5 = vsel %vm245_vm13, 0.0, %v3363_v22 }
  0x58   :  { %vm3358_vm6 = vcmp.gt.f32.partialorder %v3357_v13, 0.1  ;;  %vm3361_vm4 = vcmp.gt.f32.partialorder %v3360_v24, 0.1  ;;  %449 = vst [vmem:[%s2935_s5 + $0x80] sm:$0xff] %v417_v52  ;;  %450 = vst [vmem:[%s2935_s5 + $0x88] sm:$0xff] %v418_v38 }
  0x59   :  { %v419_v14 = vsel %vm3358_vm6, 0.0, %v3356_v11  ;;  %v420_v54 = vsel %vm3361_vm4, 0.0, %v3359_v3  ;;  %v3365_v47 = vld [vmem:[#allocation79_spill] sm:$0xff]  ;;  %453 = vst [vmem:[%s2935_s5 + $0xa0] sm:$0xff] %v421_v5  ;;  %v3367_v20 = vld [vmem:[#allocation80_spill] sm:$0xff]  ;;  %v3370_v9 = vld [vmem:[#allocation82_spill] sm:$0xff]  ;;  %v392_v43 = vadd.s32 %v391_v60, %v390_v10 }
  0x5a   :  { %451 = vst [vmem:[%s2935_s5 + $0x90] sm:$0xff] %v419_v14  ;;  %452 = vst [vmem:[%s2935_s5 + $0x98] sm:$0xff] %v420_v54  ;;  %v422_v45 = vsel %vm246_vm8, 0.0, %v3365_v47  ;;  %vm3369_vm1 = vcmp.gt.f32.partialorder %v3368_v16, 0.1  ;;  %v3371_v28 = vld [vmem:[#allocation30_spill] sm:$0xff] }
  0x5b   :  { %454 = vst [vmem:[%s2935_s5 + $0xa8] sm:$0xff] %v422_v45  ;;  %v423_v44 = vsel %vm3369_vm1, 0.0, %v3367_v20  ;;  %vm3372_vm3 = vcmp.gt.f32.partialorder %v3371_v28, 0.1  ;;  %v3373_v39 = vld [vmem:[#allocation83_spill] sm:$0xff]  ;;  %v3376_v48 = vld [vmem:[#allocation84_spill] sm:$0xff] }
  0x5c   :  { %v424_v21 = vsel %vm3372_vm3, 0.0, %v3370_v9  ;;  %v3374_v23 = vld [vmem:[#allocation31_spill] sm:$0xff]  ;;  %v426_v7 = vsel %vm250_vm11, 0.0, %v3376_v48  ;;  %v3378_v35 = vld [vmem:[#allocation24_spill] sm:$0xff]  ;;  %455 = vst [vmem:[%s2935_s5 + $0xb0] sm:$0xff] %v423_v44  ;;  %v3379_v31 = vld [vmem:[#allocation85_spill] sm:$0xff] }
  0x5d   :  { %vm3375_vm2 = vcmp.gt.f32.partialorder %v3374_v23, 0.1  ;;  %v300_v36 = vadd.f32 %v299_v61, %v3378_v35  ;;  %456 = vst [vmem:[%s2935_s5 + $0xb8] sm:$0xff] %v424_v21  ;;  %458 = vst [vmem:[%s2935_s5 + $0xc8] sm:$0xff] %v426_v7  ;;  %v427_v4 = vsel %vm251_vm12, 0.0, %v3379_v31  ;;  %v3381_v12 = vld [vmem:[#allocation86_spill] sm:$0xff] }
  0x5e   :  { %v425_v62 = vsel %vm3375_vm2, 0.0, %v3373_v39  ;;  %v428_v53 = vsel %vm252_vm10, 0.0, %v3381_v12  ;;  %459 = vst [vmem:[%s2935_s5 + $0xd0] sm:$0xff] %v427_v4  ;;  %v3383_v33 = vld [vmem:[#allocation87_spill] sm:$0xff]  ;;  %v3385_v40 = vld [vmem:[#allocation88_spill] sm:$0xff]  ;;  %v3387_v27 = vld [vmem:[#allocation89_spill] sm:$0xff] }
  0x5f   :  { %457 = vst [vmem:[%s2935_s5 + $0xc0] sm:$0xff] %v425_v62  ;;  %460 = vst [vmem:[%s2935_s5 + $0xd8] sm:$0xff] %v428_v53  ;;  %v429_v51 = vsel %vm253_vm7, 0.0, %v3383_v33  ;;  %v430_v15 = vsel %vm254_vm9, 0.0, %v3385_v40  ;;  %v431_v63 = vsel %vm255_vm14, 0.0, %v3387_v27  ;;  %v3389_v32 = vld [vmem:[#allocation90_spill] sm:$0xff] }
  0x60   :  { %v432_v49 = vsel %vm256_vm15, 0.0, %v3389_v32  ;;  %v3391_v41 = vld [vmem:[#allocation18_spill] sm:$0xff]  ;;  %v393_v46 = vrot.slane %v392_v43, 4  ;;  %461 = vst [vmem:[%s2935_s5 + $0xe0] sm:$0xff] %v429_v51  ;;  %462 = vst [vmem:[%s2935_s5 + $0xe8] sm:$0xff] %v430_v15  ;;  %v1953_v29 = vld [vmem:[%s2936_s2 + $0x8] sm:$0xff] }
  0x61   :  { %v301_v0 = vadd.f32 %v300_v36, %v3391_v41  ;;  %463 = vst [vmem:[%s2935_s5 + $0xf0] sm:$0xff] %v431_v63  ;;  %464 = vst [vmem:[%s2935_s5 + $0xf8] sm:$0xff] %v432_v49  ;;  %vm3392_vm5 = vcmp.gt.f32.partialorder %v3344_v25, 0.1  ;;  %v1948_v10 = vld [vmem:[%s2936_s2] sm:$0xff]  ;;  %v1959_v54 = vld [vmem:[%s2936_s2 + $0x10] sm:$0xff] }
  0x62   :  { %v272_v8 = vsel %vm3392_vm5, %v3343_v59, 0.0  ;;  %3393 = vst [vmem:[#allocation3_spill] sm:$0xff] %v1948_v10  ;;  %3394 = vst [vmem:[#allocation4_spill] sm:$0xff] %v1953_v29  ;;  %v3395_v52 = vld [vmem:[#allocation2_spill] sm:$0xff]  ;;  %v394_v14 = vadd.s32 %v393_v46, %v392_v43  ;;  %v498_v25 = vld [vmem:[%s2937_s3 + $0x8] sm:$0xff]  ;;  %v2015_v53 = vsel %vm245_vm13, %v3363_v22, 0.0 }
  0x63   :  { %v302_v38 = vadd.f32 %v301_v0, %v3395_v52  ;;  %3396 = vst [vmem:[#allocation5_spill] sm:$0xff] %v1959_v54  ;;  %v497_v59 = vld [vmem:[%s2937_s3] sm:$0xff]  ;;  %vm3397_vm0 = vcmp.gt.f32.partialorder %v3348_v17, 0.1  ;;  %v1973_v61 = vld [vmem:[%s2936_s2 + $0x18] sm:$0xff]  ;;  %v499_v60 = vld [vmem:[%s2937_s3 + $0x10] sm:$0xff]  ;;  %v1988_v21 = vsub.f32 %v1953_v29, %v498_v25 }
  0x64   :  { %v273_v26 = vsel %vm3397_vm0, %v3347_v18, 0.0  ;;  %3398 = vst [vmem:[#allocation6_spill] sm:$0xff] %v1973_v61  ;;  %v500_v5 = vld [vmem:[%s2937_s3 + $0x18] sm:$0xff]  ;;  %v395_v44 = vrot.slane %v394_v14, 2  ;;  %vm3399_vm6 = vcmp.gt.f32.partialorder %v3351_v6, 0.1  ;;  %v1985_v18 = vsub.f32 %v1948_v10, %v497_v59 }
  0x65   :  { %v303_v45 = vadd.f32 %v302_v38, %v272_v8  ;;  %v274_v17 = vsel %vm3399_vm6, %v3350_v30, 0.0  ;;  %v1993_v35 = vld [vmem:[%s2936_s2 + $0x20] sm:$0xff]  ;;  %v1996_v36 = vsub.f32 %v1959_v54, %v499_v60  ;;  %v1999_v43 = vsub.f32 %v1973_v61, %v500_v5  ;;  %v2049_v15 = vld [vmem:[%s2936_s2 + $0x38] sm:$0xff]  ;;  %v2064_v55 = vld [vmem:[%s2936_s2 + $0x50] sm:$0xff] }
  0x66   :  { %v396_v7 = vadd.s32 %v395_v44, %v394_v14  ;;  %3400 = vst [vmem:[#allocation7_spill] sm:$0xff] %v1993_v35  ;;  %vm3401_vm4 = vcmp.gt.f32.partialorder %v3354_v57, 0.1  ;;  %vm3402_vm1 = vcmp.gt.f32.partialorder %v3357_v13, 0.1  ;;  %v2028_v57 = vld [vmem:[%s2936_s2 + $0x30] sm:$0xff] }
  0x67   :  { %v304_v62 = vadd.f32 %v303_v45, %v273_v26  ;;  %v275_v30 = vsel %vm3401_vm4, %v3353_v56, 0.0  ;;  %v276_v6 = vsel %vm3402_vm1, %v3356_v11, 0.0  ;;  %vm3403_vm3 = vcmp.gt.f32.partialorder %v3360_v24, 0.1  ;;  %v329_v51 = vld [vmem:[%s2930_s8] sm:$0x1] }
  0x68   :  { %v2010_v4 = vsel %vm3403_vm3, %v3359_v3, 0.0  ;;  %v2023_v56 = vld [vmem:[%s2936_s2 + $0x28] sm:$0xff]  ;;  %3405 = vst [vmem:[#allocation9_spill] sm:$0xff] %v2028_v57  ;;  %v501_v11 = vld [vmem:[%s2937_s3 + $0x20] sm:$0xff]  ;;  %v2039_v3 = vsel %vm246_vm8, %v3365_v47, 0.0  ;;  %v397_v37 = vrot.slane %v396_v7, 1 }
  0x69   :  { %3404 = vst [vmem:[#allocation8_spill] sm:$0xff] %v2023_v56  ;;  %v502_v13 = vld [vmem:[%s2937_s3 + $0x28] sm:$0xff]  ;;  %vm3406_vm13 = vcmp.gt.f32.partialorder %v3368_v16, 0.1  ;;  %v305_v22 = vadd.f32 %v304_v62, %v274_v17  ;;  %3407 = vst [vmem:[#allocation10_spill] sm:$0xff] %v2049_v15  ;;  %v2054_v63 = vld [vmem:[%s2936_s2 + $0x40] sm:$0xff]  ;;  %v2195_v42 = vsub.f32 %v1993_v35, %v501_v11 }
  0x6a   :  { %v2044_v24 = vsel %vm3406_vm13, %v3367_v20, 0.0  ;;  %3408 = vst [vmem:[#allocation11_spill] sm:$0xff] %v2054_v63  ;;  %v2059_v47 = vld [vmem:[%s2936_s2 + $0x48] sm:$0xff]  ;;  %3410 = vst [vmem:[#allocation19_spill] sm:$0xff] %v2064_v55  ;;  %v503_v20 = vld [vmem:[%s2937_s3 + $0x30] sm:$0xff]  ;;  %v2083_v0 = vsel %vm3375_vm2, %v3373_v39, 0.0  ;;  %v398_v52 = vadd.s32 %v397_v37, %v396_v7 }
  0x6b   :  { %3409 = vst [vmem:[#allocation12_spill] sm:$0xff] %v2059_v47  ;;  %v504_v16 = vld [vmem:[%s2937_s3 + $0x38] sm:$0xff]  ;;  %v505_v49 = vld [vmem:[%s2937_s3 + $0x40] sm:$0xff]  ;;  %vm3411_vm8 = vcmp.gt.f32.partialorder %v3371_v28, 0.1  ;;  %v2088_v46 = vsel %vm250_vm11, %v3376_v48, 0.0  ;;  %v306_v58 = vadd.f32 %v305_v22, %v275_v30  ;;  %v534_v22 = vsub.f32 %v2023_v56, %v502_v13 }
  0x6c   :  { %v2078_v41 = vsel %vm3411_vm8, %v3370_v9, 0.0  ;;  %v2093_v8 = vsel %vm251_vm12, %v3379_v31, 0.0  ;;  %v2098_v9 = vld [vmem:[%s2936_s2 + $0x58] sm:$0xff]  ;;  %v2103_v28 = vld [vmem:[%s2936_s2 + $0x60] sm:$0xff]  ;;  %v2108_v39 = vld [vmem:[%s2936_s2 + $0x68] sm:$0xff]  ;;  %v2119_v34 = vsel %vm252_vm10, %v3381_v12, 0.0  ;;  %v399_v44 = vadd.s32 %v398_v52, %v329_v51 }
  0x6d   :  { %3412 = vst [vmem:[#allocation25_spill] sm:$0xff] %v2098_v9  ;;  %3413 = vst [vmem:[#allocation66_spill] sm:$0xff] %v2103_v28  ;;  %v506_v23 = vld [vmem:[%s2937_s3 + $0x48] sm:$0xff]  ;;  %v507_v48 = vld [vmem:[%s2937_s3 + $0x50] sm:$0xff]  ;;  %v2124_v31 = vsel %vm253_vm7, %v3383_v33, 0.0  ;;  %v2158_v25 = vsel %vm254_vm9, %v3385_v40, 0.0  ;;  %v307_v45 = vadd.f32 %v306_v58, %v276_v6  ;;  %v535_v37 = vsub.f32 %v2028_v57, %v503_v20 }
  0x6e   :  { %3414 = vst [vmem:[#allocation13_spill] sm:$0xff] %v2108_v39  ;;  %3415 = vst [vmem:[#allocation67_spill] sm:$0xff] %v2124_v31  ;;  %v2129_v38 = vld [vmem:[%s2936_s2 + $0x70] sm:$0xff]  ;;  %v2134_v14 = vld [vmem:[%s2936_s2 + $0x78] sm:$0xff]  ;;  %v2163_v26 = vsel %vm255_vm14, %v3387_v27, 0.0  ;;  %v2168_v60 = vsel %vm256_vm15, %v3389_v32, 0.0  ;;  %v536_v56 = vsub.f32 %v2049_v15, %v504_v16  ;;  %v537_v61 = vsub.f32 %v2054_v63, %v505_v49 }
  0x6f   :  { %3416 = vst [vmem:[#allocation15_spill] sm:$0xff] %v2129_v38  ;;  %3417 = vst [vmem:[#allocation68_spill] sm:$0xff] %v2134_v14  ;;  %v2139_v12 = vld [vmem:[%s2936_s2 + $0x80] sm:$0xff]  ;;  %v2144_v2 = vld [vmem:[%s2936_s2 + $0x88] sm:$0xff]  ;;  %v538_v54 = vsub.f32 %v2059_v47, %v506_v23  ;;  %v308_v29 = vadd.f32 %v307_v45, %v2010_v4 }
  0x70   :  { %3418 = vst [vmem:[#allocation16_spill] sm:$0xff] %v2139_v12  ;;  %3419 = vst [vmem:[#allocation23_spill] sm:$0xff] %v2144_v2  ;;  %v508_v33 = vld [vmem:[%s2937_s3 + $0x58] sm:$0xff]  ;;  %v509_v50 = vld [vmem:[%s2937_s3 + $0x60] sm:$0xff] }
  0x71   :  { %v510_v59 = vld [vmem:[%s2937_s3 + $0x68] sm:$0xff]  ;;  %3420 = vst [vmem:[#allocation72_spill] sm:$0xff] %v2158_v25  ;;  %3421 = vst [vmem:[#allocation17_spill] sm:$0xff] %v2163_v26  ;;  %v2173_v5 = vld [vmem:[%s2936_s2 + $0x90] sm:$0xff] }
  0x72   :  { %3422 = vst [vmem:[#allocation73_spill] sm:$0xff] %v2168_v60  ;;  %3423 = vst [vmem:[#allocation20_spill] sm:$0xff] %v2173_v5  ;;  %v2178_v40 = vld [vmem:[%s2936_s2 + $0x98] sm:$0xff]  ;;  %v2183_v19 = vld [vmem:[%s2936_s2 + $0xa0] sm:$0xff]  ;;  %v539_v60 = vsub.f32 %v2064_v55, %v507_v48  ;;  %v541_v55 = vsub.f32 %v2103_v28, %v509_v50  ;;  %v542_v47 = vsub.f32 %v2108_v39, %v510_v59 }
  0x73   :  { %3424 = vst [vmem:[#allocation74_spill] sm:$0xff] %v2178_v40  ;;  %3425 = vst [vmem:[#allocation21_spill] sm:$0xff] %v2183_v19  ;;  %v511_v27 = vld [vmem:[%s2937_s3 + $0x70] sm:$0xff]  ;;  %v512_v1 = vld [vmem:[%s2937_s3 + $0x78] sm:$0xff]  ;;  %v309_v39 = vadd.f32 %v308_v29, %v2015_v53 }
  0x74   :  { %v513_v32 = vld [vmem:[%s2937_s3 + $0x80] sm:$0xff]  ;;  %v2200_v17 = vld [vmem:[%s2936_s2 + $0xa8] sm:$0xff]  ;;  %v2205_v62 = vld [vmem:[%s2936_s2 + $0xb0] sm:$0xff]  ;;  %400 = vst [vmem:[%s2930_s8] sm:$0x1] %v399_v44  ;;  %v540_v44 = vsub.f32 %v2098_v9, %v508_v33  ;;  %v543_v25 = vsub.f32 %v2129_v38, %v511_v27  ;;  %v544_v33 = vsub.f32 %v2134_v14, %v512_v1 }
  0x75   :  { %3426 = vst [vmem:[#allocation75_spill] sm:$0xff] %v2200_v17  ;;  %3427 = vst [vmem:[#allocation22_spill] sm:$0xff] %v2205_v62  ;;  %v2210_v7 = vld [vmem:[%s2936_s2 + $0xb8] sm:$0xff]  ;;  %v2215_v30 = vld [vmem:[%s2936_s2 + $0xc0] sm:$0xff]  ;;  %v545_v50 = vsub.f32 %v2139_v12, %v513_v32  ;;  %v310_v14 = vadd.f32 %v309_v39, %v2039_v3  ;;  %v562_v3 = vmul.f32 %v1988_v21, %v1988_v21 }
  0x76   :  { %3428 = vst [vmem:[#allocation77_spill] sm:$0xff] %v2210_v7  ;;  %3429 = vst [vmem:[#allocation26_spill] sm:$0xff] %v2215_v30  ;;  %v514_v6 = vld [vmem:[%s2937_s3 + $0x88] sm:$0xff]  ;;  %v515_v51 = vld [vmem:[%s2937_s3 + $0x90] sm:$0xff]  ;;  %v567_v39 = vmul.f32 %v535_v37, %v535_v37  ;;  %v574_v21 = vmul.f32 %v542_v47, %v542_v47 }
  0x77   :  { %v516_v11 = vld [vmem:[%s2937_s3 + $0x98] sm:$0xff]  ;;  %v2231_v58 = vld [vmem:[%s2936_s2 + $0xc8] sm:$0xff]  ;;  %v2236_v52 = vld [vmem:[%s2936_s2 + $0xd0] sm:$0xff]  ;;  %v546_v59 = vsub.f32 %v2144_v2, %v514_v6  ;;  %v547_v1 = vsub.f32 %v2173_v5, %v515_v51 }
  0x78   :  { %3430 = vst [vmem:[#allocation14_spill] sm:$0xff] %v2231_v58  ;;  %3431 = vst [vmem:[#allocation78_spill] sm:$0xff] %v2236_v52  ;;  %v2241_v35 = vld [vmem:[%s2936_s2 + $0xd8] sm:$0xff]  ;;  %v517_v13 = vld [vmem:[%s2937_s3 + $0xa0] sm:$0xff]  ;;  %v548_v32 = vsub.f32 %v2178_v40, %v516_v11 }
  0x79   :  { %3432 = vst [vmem:[#allocation27_spill] sm:$0xff] %v2241_v35  ;;  %v518_v20 = vld [vmem:[%s2937_s3 + $0xa8] sm:$0xff]  ;;  %v519_v57 = vld [vmem:[%s2937_s3 + $0xb0] sm:$0xff]  ;;  %v2263_v10 = vld [vmem:[%s2936_s2 + $0xe0] sm:$0xff]  ;;  %v549_v6 = vsub.f32 %v2183_v19, %v517_v13 }
  0x7a   :  { %3433 = vst [vmem:[#allocation79_spill] sm:$0xff] %v2263_v10  ;;  %v2268_v16 = vld [vmem:[%s2936_s2 + $0xe8] sm:$0xff]  ;;  %v2273_v49 = vld [vmem:[%s2936_s2 + $0xf0] sm:$0xff]  ;;  %v2278_v4 = vld [vmem:[%s2936_s2 + $0xf8] sm:$0xff]  ;;  %v550_v29 = vsub.f32 %v2200_v17, %v518_v20  ;;  %v551_v53 = vsub.f32 %v2205_v62, %v519_v57 }
  0x7b   :  { %3434 = vst [vmem:[#allocation28_spill] sm:$0xff] %v2268_v16  ;;  %3435 = vst [vmem:[#allocation80_spill] sm:$0xff] %v2273_v49  ;;  %v520_v23 = vld [vmem:[%s2937_s3 + $0xb8] sm:$0xff]  ;;  %v521_v48 = vld [vmem:[%s2937_s3 + $0xc0] sm:$0xff] }
  0x7c   :  { %3436 = vst [vmem:[#allocation29_spill] sm:$0xff] %v2278_v4  ;;  %v522_v45 = vld [vmem:[%s2937_s3 + $0xc8] sm:$0xff]  ;;  %v523_v63 = vld [vmem:[%s2937_s3 + $0xd0] sm:$0xff]  ;;  %v524_v15 = vld [vmem:[%s2937_s3 + $0xd8] sm:$0xff]  ;;  %v552_v2 = vsub.f32 %v2210_v7, %v520_v23  ;;  %v553_v12 = vsub.f32 %v2215_v30, %v521_v48  ;;  %v311_v23 = vadd.f32 %v310_v14, %v2044_v24  ;;  %v561_v48 = vmul.f32 %v1985_v18, %v1985_v18 }
  0x7d   :  { %v525_v26 = vld [vmem:[%s2937_s3 + $0xe0] sm:$0xff]  ;;  %v526_v28 = vld [vmem:[%s2937_s3 + $0xe8] sm:$0xff]  ;;  %v527_v9 = vld [vmem:[%s2937_s3 + $0xf0] sm:$0xff]  ;;  %v554_v38 = vsub.f32 %v2231_v58, %v522_v45  ;;  %v555_v31 = vsub.f32 %v2236_v52, %v523_v63  ;;  %v556_v51 = vsub.f32 %v2241_v35, %v524_v15  ;;  %v563_v63 = vmul.f32 %v1996_v36, %v1996_v36 }
  0x7e   :  { %v528_v27 = vld [vmem:[%s2937_s3 + $0xf8] sm:$0xff]  ;;  %v557_v11 = vsub.f32 %v2263_v10, %v525_v26  ;;  %v558_v13 = vsub.f32 %v2268_v16, %v526_v28  ;;  %v559_v20 = vsub.f32 %v2273_v49, %v527_v9  ;;  %v564_v15 = vmul.f32 %v1999_v43, %v1999_v43 }
  0x7f   :  { %v560_v57 = vsub.f32 %v2278_v4, %v528_v27  ;;  %v565_v28 = vmul.f32 %v2195_v42, %v2195_v42  ;;  %v566_v9 = vmul.f32 %v534_v22, %v534_v22  ;;  %v312_v26 = vadd.f32 %v311_v23, %v2078_v41  ;;  %v3447_v23 = vld [vmem:[#allocation48_spill] sm:$0xff] }
  0x80   :  { %v568_v24 = vmul.f32 %v536_v56, %v536_v56  ;;  %v569_v14 = vmul.f32 %v537_v61, %v537_v61  ;;  %v570_v45 = vmul.f32 %v538_v54, %v538_v54  ;;  %v571_v18 = vmul.f32 %v539_v60, %v539_v60 }
  0x81   :  { %v572_v27 = vmul.f32 %v540_v44, %v540_v44  ;;  %v573_v10 = vmul.f32 %v541_v55, %v541_v55  ;;  %v313_v35 = vadd.f32 %v312_v26, %v2083_v0  ;;  %v575_v36 = vmul.f32 %v543_v25, %v543_v25  ;;  %v3454_v26 = vld [vmem:[#allocation51_spill] sm:$0xff] }
  0x82   :  { %v576_v52 = vmul.f32 %v544_v33, %v544_v33  ;;  %v577_v58 = vmul.f32 %v545_v50, %v545_v50  ;;  %v578_v43 = vmul.f32 %v546_v59, %v546_v59  ;;  %v579_v4 = vmul.f32 %v547_v1, %v547_v1  ;;  %v3437_v50 = vld [vmem:[#allocation39_spill] sm:$0xff]  ;;  %v3438_v1 = vld [vmem:[#allocation40_spill] sm:$0xff] }
  0x83   :  { %v580_v49 = vmul.f32 %v548_v32, %v548_v32  ;;  %v581_v42 = vmul.f32 %v549_v6, %v549_v6  ;;  %v314_v22 = vadd.f32 %v313_v35, %v2088_v46  ;;  %v582_v37 = vmul.f32 %v550_v29, %v550_v29  ;;  %v3439_v35 = vld [vmem:[#allocation41_spill] sm:$0xff]  ;;  %v3442_v6 = vld [vmem:[#allocation44_spill] sm:$0xff] }
  0x84   :  { %v583_v41 = vmul.f32 %v551_v53, %v551_v53  ;;  %v584_v56 = vmul.f32 %v552_v2, %v552_v2  ;;  %v585_v61 = vmul.f32 %v553_v12, %v553_v12  ;;  %v586_v54 = vmul.f32 %v554_v38, %v554_v38  ;;  %v3440_v38 = vld [vmem:[#allocation42_spill] sm:$0xff]  ;;  %v3441_v2 = vld [vmem:[#allocation43_spill] sm:$0xff]  ;;  %v3443_v53 = vld [vmem:[#allocation45_spill] sm:$0xff] }
  0x85   :  { %v587_v60 = vmul.f32 %v555_v31, %v555_v31  ;;  %v588_v44 = vmul.f32 %v556_v51, %v556_v51  ;;  %v315_v47 = vadd.f32 %v314_v22, %v2093_v8  ;;  %v589_v55 = vmul.f32 %v557_v11, %v557_v11  ;;  %v3444_v11 = vld [vmem:[#allocation46_spill] sm:$0xff]  ;;  %v3456_v22 = vld [vmem:[#allocation52_spill] sm:$0xff] }
  0x86   :  { %v590_v0 = vmul.f32 %v558_v13, %v558_v13  ;;  %v591_v25 = vmul.f32 %v559_v20, %v559_v20  ;;  %v592_v33 = vmul.f32 %v560_v57, %v560_v57  ;;  %v2346_v59 = vmul.f32 %v561_v48, %v3437_v50  ;;  %v3445_v20 = vld [vmem:[#allocation47_spill] sm:$0xff]  ;;  %v3460_v50 = vld [vmem:[#allocation54_spill] sm:$0xff] }
  0x87   :  { %v2349_v32 = vmul.f32 %v562_v3, %v3438_v1  ;;  %v2352_v46 = vmul.f32 %v563_v63, %v3439_v35  ;;  %v316_v12 = vadd.f32 %v315_v47, %v2119_v34  ;;  %v2356_v31 = vmul.f32 %v564_v15, %v3440_v38  ;;  %v3449_v48 = vld [vmem:[#allocation67_spill] sm:$0xff]  ;;  %v3450_v63 = vld [vmem:[#allocation49_spill] sm:$0xff]  ;;  %v3465_v38 = vld [vmem:[#allocation56_spill] sm:$0xff] }
  0x88   :  { %v2359_v8 = vmul.f32 %v565_v28, %v3441_v2  ;;  %v2362_v29 = vmul.f32 %v566_v9, %v3442_v6  ;;  %v2365_v51 = vmul.f32 %v567_v39, %v3443_v53  ;;  %v2368_v13 = vmul.f32 %v568_v24, %v3444_v11  ;;  %v3452_v28 = vld [vmem:[#allocation50_spill] sm:$0xff]  ;;  %v3458_v47 = vld [vmem:[#allocation53_spill] sm:$0xff]  ;;  %v3462_v1 = vld [vmem:[#allocation55_spill] sm:$0xff] }
  0x89   :  { %v2371_v57 = vmul.f32 %v569_v14, %v3445_v20  ;;  %v2374_v34 = vmul.f32 %v570_v45, %v3447_v23  ;;  %v317_v3 = vadd.f32 %v316_v12, %v3449_v48  ;;  %v2378_v15 = vmul.f32 %v571_v18, %v3450_v63  ;;  %v3464_v18 = vld [vmem:[#allocation72_spill] sm:$0xff]  ;;  %v3467_v2 = vld [vmem:[#allocation57_spill] sm:$0xff]  ;;  %v3469_v6 = vld [vmem:[#allocation58_spill] sm:$0xff] }
  0x8a   :  { %v2381_v9 = vmul.f32 %v572_v27, %v3452_v28  ;;  %v2384_v39 = vmul.f32 %v573_v10, %v3454_v26  ;;  %v2387_v24 = vmul.f32 %v574_v21, %v3456_v22  ;;  %v2390_v14 = vmul.f32 %v575_v36, %v3458_v47  ;;  %v3471_v53 = vld [vmem:[#allocation59_spill] sm:$0xff]  ;;  %v3473_v11 = vld [vmem:[#allocation60_spill] sm:$0xff]  ;;  %v3475_v20 = vld [vmem:[#allocation61_spill] sm:$0xff] }
  0x8b   :  { %3446 = vst [vmem:[#allocation82_spill] sm:$0xff] %v2371_v57  ;;  %3448 = vst [vmem:[#allocation30_spill] sm:$0xff] %v2374_v34  ;;  %v2393_v45 = vmul.f32 %v576_v52, %v3460_v50  ;;  %v2396_v35 = vmul.f32 %v577_v58, %v3462_v1  ;;  %v318_v12 = vadd.f32 %v317_v3, %v3464_v18  ;;  %v3477_v23 = vld [vmem:[#allocation62_spill] sm:$0xff]  ;;  %v3480_v63 = vld [vmem:[#allocation63_spill] sm:$0xff] }
  0x8c   :  { %3451 = vst [vmem:[#allocation83_spill] sm:$0xff] %v2378_v15  ;;  %3453 = vst [vmem:[#allocation31_spill] sm:$0xff] %v2381_v9  ;;  %v2400_v27 = vmul.f32 %v578_v43, %v3465_v38  ;;  %v2403_v10 = vmul.f32 %v579_v4, %v3467_v2  ;;  %v2406_v21 = vmul.f32 %v580_v49, %v3469_v6  ;;  %v3479_v43 = vld [vmem:[#allocation17_spill] sm:$0xff]  ;;  %v3482_v28 = vld [vmem:[#allocation64_spill] sm:$0xff] }
  0x8d   :  { %3455 = vst [vmem:[#allocation84_spill] sm:$0xff] %v2384_v39  ;;  %3457 = vst [vmem:[#allocation32_spill] sm:$0xff] %v2387_v24  ;;  %v2409_v36 = vmul.f32 %v581_v42, %v3471_v53  ;;  %v2412_v52 = vmul.f32 %v582_v37, %v3473_v11  ;;  %v2415_v58 = vmul.f32 %v583_v41, %v3475_v20  ;;  %v3484_v26 = vld [vmem:[#allocation65_spill] sm:$0xff]  ;;  %v3488_v47 = vld [vmem:[#allocation70_spill] sm:$0xff] }
  0x8e   :  { %3459 = vst [vmem:[#allocation24_spill] sm:$0xff] %v2390_v14  ;;  %3461 = vst [vmem:[#allocation85_spill] sm:$0xff] %v2393_v45  ;;  %v2418_v48 = vmul.f32 %v584_v56, %v3477_v23  ;;  %v319_v3 = vadd.f32 %v318_v12, %v3479_v43  ;;  %v2422_v4 = vmul.f32 %v585_v61, %v3480_v63  ;;  %v3486_v22 = vld [vmem:[#allocation69_spill] sm:$0xff]  ;;  %v3490_v50 = vld [vmem:[#allocation3_spill] sm:$0xff] }
  0x8f   :  { %3463 = vst [vmem:[#allocation33_spill] sm:$0xff] %v2396_v35  ;;  %3466 = vst [vmem:[#allocation86_spill] sm:$0xff] %v2400_v27  ;;  %v2425_v49 = vmul.f32 %v586_v54, %v3482_v28  ;;  %v2428_v42 = vmul.f32 %v587_v60, %v3484_v26  ;;  %v2431_v37 = vmul.f32 %v588_v44, %v3486_v22  ;;  %vm3126_vm7 = vcmp.gt.f32.partialorder %v3490_v50, 0.1  ;;  %v3491_v56 = vld [vmem:[#allocation4_spill] sm:$0xff]  ;;  %v3492_v1 = vld [vmem:[#allocation73_spill] sm:$0xff] }
  0x90   :  { %3468 = vst [vmem:[#allocation34_spill] sm:$0xff] %v2403_v10  ;;  %3470 = vst [vmem:[#allocation87_spill] sm:$0xff] %v2406_v21  ;;  %v2434_v41 = vmul.f32 %v589_v55, %v3488_v47  ;;  %vm3125_vm9 = vcmp.gt.f32.partialorder %v3491_v56, 0.1  ;;  %v320_v18 = vadd.f32 %v319_v3, %v3492_v1  ;;  %v3493_v61 = vld [vmem:[#allocation5_spill] sm:$0xff]  ;;  %v3494_v12 = vld [vmem:[#allocation6_spill] sm:$0xff] }
  0x91   :  { %3472 = vst [vmem:[#allocation35_spill] sm:$0xff] %v2409_v36  ;;  %3474 = vst [vmem:[#allocation88_spill] sm:$0xff] %v2412_v52  ;;  %vm3127_vm10 = vcmp.gt.f32.partialorder %v3493_v61, 0.1  ;;  %vm3152_vm11 = vcmp.gt.f32.partialorder %v3494_v12, 0.1 }
  0x92   :  { %3476 = vst [vmem:[#allocation36_spill] sm:$0xff] %v2415_v58  ;;  %3478 = vst [vmem:[#allocation89_spill] sm:$0xff] %v2418_v48  ;;  %v3495_v54 = vld [vmem:[#allocation7_spill] sm:$0xff]  ;;  %v3498_v44 = vld [vmem:[#allocation8_spill] sm:$0xff]  ;;  %v321_v6 = vrot.slane %v320_v18, 4 }
  0x93   :  { %3481 = vst [vmem:[#allocation37_spill] sm:$0xff] %v2422_v4  ;;  %3483 = vst [vmem:[#allocation90_spill] sm:$0xff] %v2425_v49  ;;  %vm629_vm12 = vcmp.gt.f32.partialorder %v3495_v54, 0.1  ;;  %v3496_v60 = vld [vmem:[#allocation71_spill] sm:$0xff]  ;;  %v3499_v2 = vld [vmem:[#allocation9_spill] sm:$0xff] }
  0x94   :  { %3485 = vst [vmem:[#allocation38_spill] sm:$0xff] %v2428_v42  ;;  %3487 = vst [vmem:[#allocation18_spill] sm:$0xff] %v2431_v37  ;;  %v2443_v38 = vmul.f32 %v590_v0, %v3496_v60  ;;  %vm3136_vm14 = vcmp.gt.f32.partialorder %v3498_v44, 0.1  ;;  %vm3134_vm15 = vcmp.gt.f32.partialorder %v3499_v2, 0.1  ;;  %v322_v26 = vadd.f32 %v321_v6, %v320_v18 }
  0x95   :  { %3489 = vst [vmem:[#allocation2_spill] sm:$0xff] %v2434_v41  ;;  %v3500_v55 = vld [vmem:[#allocation10_spill] sm:$0xff]  ;;  %v3501_v53 = vld [vmem:[#allocation76_spill] sm:$0xff]  ;;  %v3503_v20 = vld [vmem:[#allocation11_spill] sm:$0xff]  ;;  %v659_v60 = vsel %vm3125_vm9, %v2349_v32, 0.0  ;;  %v660_v18 = vsel %vm3127_vm10, %v2352_v46, 0.0 }
  0x96   :  { %3497 = vst [vmem:[#allocation39_spill] sm:$0xff] %v2443_v38  ;;  %vm3133_vm5 = vcmp.gt.f32.partialorder %v3500_v55, 0.1  ;;  %v2449_v11 = vmul.f32 %v591_v25, %v3501_v53  ;;  %v3504_v23 = vld [vmem:[#allocation12_spill] sm:$0xff]  ;;  %v3505_v43 = vld [vmem:[#allocation81_spill] sm:$0xff]  ;;  %v3507_v63 = vld [vmem:[#allocation19_spill] sm:$0xff] }
  0x97   :  { %vm634_vm6 = vcmp.gt.f32.partialorder %v3504_v23, 0.1  ;;  %v2454_v3 = vmul.f32 %v592_v33, %v3505_v43  ;;  %vm635_vm4 = vcmp.gt.f32.partialorder %v3507_v63, 0.1  ;;  %v3508_v0 = vld [vmem:[#allocation25_spill] sm:$0xff]  ;;  %v3509_v28 = vld [vmem:[#allocation66_spill] sm:$0xff] }
  0x98   :  { %3502 = vst [vmem:[#allocation40_spill] sm:$0xff] %v2449_v11  ;;  %vm636_vm1 = vcmp.gt.f32.partialorder %v3508_v0, 0.1  ;;  %vm637_vm3 = vcmp.gt.f32.partialorder %v3509_v28, 0.1  ;;  %v3510_v22 = vld [vmem:[#allocation13_spill] sm:$0xff] }
  0x99   :  { %3506 = vst [vmem:[#allocation41_spill] sm:$0xff] %v2454_v3  ;;  %v3511_v47 = vld [vmem:[#allocation15_spill] sm:$0xff]  ;;  %v3512_v25 = vld [vmem:[#allocation68_spill] sm:$0xff]  ;;  %v658_v33 = vsel %vm3126_vm7, %v2346_v59, 0.0  ;;  %v323_v6 = vrot.slane %v322_v26, 2  ;;  %v661_v43 = vsel %vm3152_vm11, %v2356_v31, 0.0 }
  0x9a   :  { %vm639_vm8 = vcmp.gt.f32.partialorder %v3511_v47, 0.1  ;;  %vm640_vm2 = vcmp.gt.f32.partialorder %v3512_v25, 0.1  ;;  %v3513_v1 = vld [vmem:[#allocation16_spill] sm:$0xff]  ;;  %v3514_v53 = vld [vmem:[#allocation23_spill] sm:$0xff] }
  0x9b   :  { %vm641_vm0 = vcmp.gt.f32.partialorder %v3513_v1, 0.1  ;;  %v662_v3 = vsel %vm629_vm12, %v2359_v8, 0.0  ;;  %v663_v11 = vsel %vm3136_vm14, %v2362_v29, 0.0  ;;  %v2488_v38 = vsel %vm3134_vm15, %v2365_v51, 0.0  ;;  %v3517_v4 = vld [vmem:[#allocation80_spill] sm:$0xff] }
  0x9c   :  { %v2493_v41 = vsel %vm3133_vm5, %v2368_v13, 0.0  ;;  %vm3515_vm13 = vcmp.gt.f32.partialorder %v3503_v20, 0.1  ;;  %v2503_v42 = vsel %vm634_vm6, %v2374_v34, 0.0  ;;  %v324_v49 = vadd.f32 %v323_v6, %v322_v26  ;;  %v3518_v48 = vld [vmem:[#allocation29_spill] sm:$0xff]  ;;  %v3522_v52 = vld [vmem:[#allocation14_spill] sm:$0xff] }
  0x9d   :  { %v2498_v37 = vsel %vm3515_vm13, %v2371_v57, 0.0  ;;  %3516 = vst [vmem:[#allocation42_spill] sm:$0xff] %v2503_v42  ;;  %vm646_vm10 = vcmp.gt.f32.partialorder %v2200_v17, 0.1  ;;  %vm647_vm7 = vcmp.gt.f32.partialorder %v2205_v62, 0.1 }
  0x9e   :  { %vm648_vm9 = vcmp.gt.f32.partialorder %v2210_v7, 0.1  ;;  %v2515_v58 = vsel %vm635_vm4, %v2378_v15, 0.0  ;;  %v2520_v26 = vsel %vm636_vm1, %v2381_v9, 0.0  ;;  %v2525_v6 = vsel %vm637_vm3, %v2384_v39, 0.0  ;;  %v3523_v36 = vld [vmem:[#allocation78_spill] sm:$0xff] }
  0x9f   :  { %3519 = vst [vmem:[#allocation43_spill] sm:$0xff] %v2515_v58  ;;  %3520 = vst [vmem:[#allocation44_spill] sm:$0xff] %v2520_v26  ;;  %v3524_v21 = vld [vmem:[#allocation27_spill] sm:$0xff]  ;;  %vm3525_vm5 = vcmp.gt.f32.partialorder %v3510_v22, 0.1  ;;  %v2538_v27 = vsel %vm639_vm8, %v2390_v14, 0.0 }
  0xa0   :  { %3521 = vst [vmem:[#allocation45_spill] sm:$0xff] %v2525_v6  ;;  %v2533_v10 = vsel %vm3525_vm5, %v2387_v24, 0.0  ;;  %3527 = vst [vmem:[#allocation47_spill] sm:$0xff] %v2538_v27  ;;  %v2543_v6 = vsel %vm640_vm2, %v2393_v45, 0.0  ;;  %v2548_v26 = vsel %vm641_vm0, %v2396_v35, 0.0  ;;  %v325_v39 = vrot.slane %v324_v49, 1 }
  0xa1   :  { %3526 = vst [vmem:[#allocation46_spill] sm:$0xff] %v2533_v10  ;;  %3528 = vst [vmem:[#allocation48_spill] sm:$0xff] %v2543_v6  ;;  %v3530_v58 = vld [vmem:[#allocation79_spill] sm:$0xff]  ;;  %v690_v24 = vadd.f32 %v659_v60, %v658_v33  ;;  %v3531_v10 = vmov 0   ;;  %vm3532_vm5 = vcmp.gt.f32.partialorder %v3490_v50, 0.1 }
  0xa2   :  { %3529 = vst [vmem:[#allocation67_spill] sm:$0xff] %v2548_v26  ;;  %vm653_vm13 = vcmp.gt.f32.partialorder %v3530_v58, 0.1  ;;  %v730_v9 = vsel %vm3532_vm5, 1, %v3531_v10  ;;  %vm3533_vm14 = vcmp.gt.f32.partialorder %v3491_v56, 0.1  ;;  %v326_v45 = vadd.f32 %v325_v39, %v324_v49 }
  0xa3   :  { %v731_v27 = vsel %vm3533_vm14, 1, %v3531_v10  ;;  %v257_v6 = vld [vmem:[%s2928_s6] sm:$0x1]  ;;  %vm3534_vm15 = vcmp.gt.f32.partialorder %v3493_v61, 0.1  ;;  %v733_v33 = vsel %vm3152_vm11, 1, %v3531_v10  ;;  %v691_v14 = vadd.f32 %v690_v24, %v660_v18 }
  0xa4   :  { %v732_v26 = vsel %vm3534_vm15, 1, %v3531_v10  ;;  %v734_v60 = vsel %vm629_vm12, 1, %v3531_v10  ;;  %vm3535_vm5 = vcmp.gt.f32.partialorder %v3498_v44, 0.1  ;;  %vm3536_vm14 = vcmp.gt.f32.partialorder %v3499_v2, 0.1 }
  0xa5   :  { %v735_v35 = vsel %vm3535_vm5, 1, %v3531_v10  ;;  %v736_v15 = vsel %vm3536_vm14, 1, %v3531_v10  ;;  %vm3537_vm15 = vcmp.gt.f32.partialorder %v3500_v55, 0.1  ;;  %vm3538_vm11 = vcmp.gt.f32.partialorder %v3503_v20, 0.1 }
  0xa6   :  { %v737_v34 = vsel %vm3537_vm15, 1, %v3531_v10  ;;  %v738_v42 = vsel %vm3538_vm11, 1, %v3531_v10  ;;  %v739_v57 = vsel %vm634_vm6, 1, %v3531_v10  ;;  %v740_v39 = vsel %vm635_vm4, 1, %v3531_v10  ;;  %v3569_v54 = vld [vmem:[#allocation43_spill] sm:$0xff]  ;;  %v3571_v0 = vld [vmem:[#allocation32_spill] sm:$0xff] }
  0xa7   :  { %v741_v24 = vsel %vm636_vm1, 1, %v3531_v10  ;;  %v327_v49 = vadd.f32 %v326_v45, %v257_v6  ;;  %v692_v18 = vadd.f32 %v691_v14, %v661_v43  ;;  %v742_v55 = vsel %vm637_vm3, 1, %v3531_v10 }
  0xa8   :  { %vm3539_vm11 = vcmp.gt.f32.partialorder %v3510_v22, 0.1  ;;  %v744_v23 = vsel %vm639_vm8, 1, %v3531_v10  ;;  %v745_v63 = vsel %vm640_vm2, 1, %v3531_v10  ;;  %v746_v14 = vsel %vm641_vm0, 1, %v3531_v10  ;;  %v3624_v47 = vld [vmem:[#allocation48_spill] sm:$0xff] }
  0xa9   :  { %v743_v20 = vsel %vm3539_vm11, 1, %v3531_v10  ;;  %vm3540_vm5 = vcmp.gt.f32.partialorder %v3514_v53, 0.1  ;;  %328 = vst [vmem:[%s2928_s6] sm:$0x1] %v327_v49  ;;  %v693_v43 = vadd.f32 %v692_v18, %v662_v3  ;;  %vm3541_vm14 = vcmp.gt.f32.partialorder %v2173_v5, 0.1 }
  0xaa   :  { %v747_v45 = vsel %vm3540_vm5, 1, %v3531_v10  ;;  %v748_v6 = vsel %vm3541_vm14, 1, %v3531_v10  ;;  %vm3542_vm15 = vcmp.gt.f32.partialorder %v2178_v40, 0.1  ;;  %vm3543_vm11 = vcmp.gt.f32.partialorder %v2183_v19, 0.1 }
  0xab   :  { %v749_v25 = vsel %vm3542_vm15, 1, %v3531_v10  ;;  %v750_v1 = vsel %vm3543_vm11, 1, %v3531_v10  ;;  %v751_v53 = vsel %vm646_vm10, 1, %v3531_v10  ;;  %v752_v3 = vsel %vm647_vm7, 1, %v3531_v10 }
  0xac   :  { %v753_v49 = vsel %vm648_vm9, 1, %v3531_v10  ;;  %vm3544_vm5 = vcmp.gt.f32.partialorder %v2215_v30, 0.1  ;;  %v694_v40 = vadd.f32 %v693_v43, %v663_v11  ;;  %vm3545_vm14 = vcmp.gt.f32.partialorder %v3522_v52, 0.1 }
  0xad   :  { %v754_v18 = vsel %vm3544_vm5, 1, %v3531_v10  ;;  %v755_v19 = vsel %vm3545_vm14, 1, %v3531_v10  ;;  %vm3546_vm15 = vcmp.gt.f32.partialorder %v3523_v36, 0.1  ;;  %vm3547_vm11 = vcmp.gt.f32.partialorder %v3524_v21, 0.1 }
  0xae   :  { %v756_v17 = vsel %vm3546_vm15, 1, %v3531_v10  ;;  %v2641_v62 = vsel %vm3547_vm11, 1, %v3531_v10  ;;  %v2646_v7 = vsel %vm653_vm13, 1, %v3531_v10  ;;  %vm3548_vm5 = vcmp.gt.f32.partialorder %v2268_v16, 0.1 }
  0xaf   :  { %v2651_v11 = vsel %vm3548_vm5, 1, %v3531_v10  ;;  %vm3549_vm14 = vcmp.gt.f32.partialorder %v3517_v4, 0.1  ;;  %vm3550_vm15 = vcmp.gt.f32.partialorder %v3518_v48, 0.1  ;;  %v695_v36 = vadd.f32 %v694_v40, %v2488_v38 }
  0xb0   :  { %v2656_v43 = vsel %vm3549_vm14, 1, %v3531_v10  ;;  %v2661_v21 = vsel %vm3550_vm15, 1, %v3531_v10  ;;  %v762_v58 = vadd.s32 %v734_v60, %v730_v9  ;;  %v763_v52 = vadd.s32 %v735_v35, %v731_v27  ;;  %v3560_v35 = vld [vmem:[#allocation82_spill] sm:$0xff]  ;;  %v3561_v27 = vld [vmem:[#allocation11_spill] sm:$0xff] }
  0xb1   :  { %3551 = vst [vmem:[#allocation49_spill] sm:$0xff] %v2661_v21  ;;  %v764_v30 = vadd.s32 %v736_v15, %v732_v26  ;;  %v765_v5 = vadd.s32 %v737_v34, %v733_v33  ;;  %vm3552_vm11 = vcmp.gt.f32.partialorder %v3490_v50, 0.1  ;;  %vm3553_vm5 = vcmp.gt.f32.partialorder %v3491_v56, 0.1  ;;  %v3574_v26 = vld [vmem:[#allocation44_spill] sm:$0xff] }
  0xb2   :  { %v801_v16 = vsel %vm3552_vm11, 0.0, %v2346_v59  ;;  %v802_v4 = vsel %vm3553_vm5, 0.0, %v2349_v32  ;;  %vm3554_vm14 = vcmp.gt.f32.partialorder %v3493_v61, 0.1  ;;  %v696_v10 = vadd.f32 %v695_v36, %v2493_v41  ;;  %v3563_v36 = vld [vmem:[#allocation42_spill] sm:$0xff]  ;;  %v3566_v41 = vld [vmem:[#allocation83_spill] sm:$0xff] }
  0xb3   :  { %v803_v48 = vsel %vm3554_vm14, 0.0, %v2352_v46  ;;  %v766_v21 = vadd.s32 %v762_v58, %v738_v42  ;;  %v767_v40 = vadd.s32 %v763_v52, %v739_v57  ;;  %v768_v9 = vadd.s32 %v764_v30, %v740_v39  ;;  %886 = vst [vmem:[%s2935_s5 + $0x100] sm:$0xff] %v801_v16  ;;  %887 = vst [vmem:[%s2935_s5 + $0x108] sm:$0xff] %v802_v4  ;;  %v3568_v61 = vld [vmem:[#allocation31_spill] sm:$0xff]  ;;  %v3601_v42 = vld [vmem:[#allocation26_spill] sm:$0xff] }
  0xb4   :  { %888 = vst [vmem:[%s2935_s5 + $0x110] sm:$0xff] %v803_v48  ;;  %v769_v59 = vadd.s32 %v765_v5, %v741_v24  ;;  %vm3555_vm15 = vcmp.gt.f32.partialorder %v3494_v12, 0.1  ;;  %v805_v30 = vsel %vm629_vm12, 0.0, %v2359_v8  ;;  %vm3556_vm11 = vcmp.gt.f32.partialorder %v3498_v44, 0.1 }
  0xb5   :  { %v804_v32 = vsel %vm3555_vm15, 0.0, %v2356_v31  ;;  %v806_v16 = vsel %vm3556_vm11, 0.0, %v2362_v29  ;;  %v697_v46 = vadd.f32 %v696_v10, %v2498_v37  ;;  %v770_v57 = vadd.s32 %v766_v21, %v742_v55  ;;  %890 = vst [vmem:[%s2935_s5 + $0x120] sm:$0xff] %v805_v30  ;;  %v3558_v8 = vld [vmem:[#allocation10_spill] sm:$0xff] }
  0xb6   :  { %v771_v34 = vadd.s32 %v767_v40, %v743_v20  ;;  %v772_v15 = vadd.s32 %v768_v9, %v744_v23  ;;  %889 = vst [vmem:[%s2935_s5 + $0x118] sm:$0xff] %v804_v32  ;;  %891 = vst [vmem:[%s2935_s5 + $0x128] sm:$0xff] %v806_v16  ;;  %v773_v5 = vadd.s32 %v769_v59, %v745_v63  ;;  %vm3557_vm12 = vcmp.gt.f32.partialorder %v3499_v2, 0.1  ;;  %v3570_v23 = vld [vmem:[#allocation84_spill] sm:$0xff]  ;;  %v3584_v30 = vld [vmem:[#allocation34_spill] sm:$0xff] }
  0xb7   :  { %v807_v31 = vsel %vm3557_vm12, 0.0, %v2365_v51  ;;  %vm3559_vm5 = vcmp.gt.f32.partialorder %v3558_v8, 0.1  ;;  %vm3562_vm14 = vcmp.gt.f32.partialorder %v3561_v27, 0.1  ;;  %v698_v52 = vadd.f32 %v697_v46, %v3563_v36  ;;  %v3587_v16 = vld [vmem:[#allocation87_spill] sm:$0xff] }
  0xb8   :  { %v808_v29 = vsel %vm3559_vm5, 0.0, %v2368_v13  ;;  %v809_v21 = vsel %vm3562_vm14, 0.0, %v3560_v35  ;;  %v774_v58 = vadd.s32 %v770_v57, %v746_v14  ;;  %v775_v48 = vadd.s32 %v771_v34, %v747_v45  ;;  %892 = vst [vmem:[%s2935_s5 + $0x130] sm:$0xff] %v807_v31  ;;  %v3564_v13 = vld [vmem:[#allocation30_spill] sm:$0xff]  ;;  %v3583_v59 = vld [vmem:[#allocation49_spill] sm:$0xff]  ;;  %v3590_v57 = vld [vmem:[#allocation35_spill] sm:$0xff] }
  0xb9   :  { %v776_v4 = vadd.s32 %v772_v15, %v748_v6  ;;  %893 = vst [vmem:[%s2935_s5 + $0x138] sm:$0xff] %v808_v29  ;;  %894 = vst [vmem:[%s2935_s5 + $0x140] sm:$0xff] %v809_v21  ;;  %v777_v51 = vadd.s32 %v773_v5, %v749_v25  ;;  %v810_v37 = vsel %vm634_vm6, 0.0, %v3564_v13  ;;  %v811_v56 = vsel %vm635_vm4, 0.0, %v3566_v41  ;;  %v3579_v6 = vld [vmem:[#allocation86_spill] sm:$0xff]  ;;  %v3591_v34 = vld [vmem:[#allocation21_spill] sm:$0xff] }
  0xba   :  { %v812_v12 = vsel %vm636_vm1, 0.0, %v3568_v61  ;;  %v699_v38 = vadd.f32 %v698_v52, %v3569_v54  ;;  %v778_v44 = vadd.s32 %v774_v58, %v750_v1  ;;  %v779_v2 = vadd.s32 %v775_v48, %v751_v53  ;;  %895 = vst [vmem:[%s2935_s5 + $0x148] sm:$0xff] %v810_v37  ;;  %896 = vst [vmem:[%s2935_s5 + $0x150] sm:$0xff] %v811_v56  ;;  %v3573_v1 = vld [vmem:[#allocation24_spill] sm:$0xff]  ;;  %v3593_v5 = vld [vmem:[#allocation46_spill] sm:$0xff] }
  0xbb   :  { %v780_v55 = vadd.s32 %v776_v4, %v752_v3  ;;  %897 = vst [vmem:[%s2935_s5 + $0x158] sm:$0xff] %v812_v12  ;;  %v781_v20 = vadd.s32 %v777_v51, %v753_v49  ;;  %v813_v63 = vsel %vm637_vm3, 0.0, %v3570_v23  ;;  %vm3572_vm6 = vcmp.gt.f32.partialorder %v3510_v22, 0.1  ;;  %v3575_v22 = vld [vmem:[#allocation85_spill] sm:$0xff]  ;;  %v3580_v3 = vld [vmem:[#allocation23_spill] sm:$0xff] }
  0xbc   :  { %v814_v25 = vsel %vm3572_vm6, 0.0, %v3571_v0  ;;  %v815_v53 = vsel %vm639_vm8, 0.0, %v3573_v1  ;;  %v700_v33 = vadd.f32 %v699_v38, %v3574_v26  ;;  %v782_v60 = vadd.s32 %v778_v44, %v754_v18  ;;  %898 = vst [vmem:[%s2935_s5 + $0x160] sm:$0xff] %v813_v63  ;;  %v3582_v18 = vld [vmem:[#allocation45_spill] sm:$0xff]  ;;  %v3594_v29 = vld [vmem:[#allocation88_spill] sm:$0xff]  ;;  %v3603_v41 = vld [vmem:[#allocation90_spill] sm:$0xff] }
  0xbd   :  { %v783_v39 = vadd.s32 %v779_v2, %v755_v19  ;;  %v784_v24 = vadd.s32 %v780_v55, %v756_v17  ;;  %899 = vst [vmem:[%s2935_s5 + $0x168] sm:$0xff] %v814_v25  ;;  %900 = vst [vmem:[%s2935_s5 + $0x170] sm:$0xff] %v815_v53  ;;  %v785_v28 = vadd.s32 %v781_v20, %v2641_v62  ;;  %v816_v14 = vsel %vm640_vm2, 0.0, %v3575_v22  ;;  %v3577_v19 = vld [vmem:[#allocation33_spill] sm:$0xff]  ;;  %v3596_v21 = vld [vmem:[#allocation36_spill] sm:$0xff] }
  0xbe   :  { %v817_v45 = vsel %vm641_vm0, 0.0, %v3577_v19  ;;  %vm3581_vm4 = vcmp.gt.f32.partialorder %v3580_v3, 0.1  ;;  %v701_v10 = vadd.f32 %v700_v33, %v3582_v18  ;;  %v786_v40 = vadd.s32 %v782_v60, %v2646_v7  ;;  %901 = vst [vmem:[%s2935_s5 + $0x178] sm:$0xff] %v816_v14  ;;  %v3585_v7 = vld [vmem:[#allocation20_spill] sm:$0xff]  ;;  %v3598_v48 = vld [vmem:[#allocation89_spill] sm:$0xff] }
  0xbf   :  { %v818_v49 = vsel %vm3581_vm4, 0.0, %v3579_v6  ;;  %v787_v9 = vadd.s32 %v783_v39, %v2651_v11  ;;  %v788_v62 = vadd.s32 %v784_v24, %v2656_v43  ;;  %902 = vst [vmem:[%s2935_s5 + $0x180] sm:$0xff] %v817_v45  ;;  %v789_v32 = vadd.s32 %v785_v28, %v3583_v59  ;;  %v3588_v43 = vld [vmem:[#allocation74_spill] sm:$0xff]  ;;  %v3600_v13 = vld [vmem:[#allocation37_spill] sm:$0xff]  ;;  %v3606_v61 = vld [vmem:[#allocation47_spill] sm:$0xff] }
  0xc0   :  { %903 = vst [vmem:[%s2935_s5 + $0x188] sm:$0xff] %v818_v49  ;;  %vm3586_vm0 = vcmp.gt.f32.partialorder %v3585_v7, 0.1  ;;  %vm3589_vm1 = vcmp.gt.f32.partialorder %v3588_v43, 0.1  ;;  %v702_v31 = vadd.f32 %v701_v10, %v3593_v5  ;;  %v822_v27 = vsel %vm646_vm10, 0.0, %v3594_v29  ;;  %vm3625_vm6 = vmmov %vm3581_vm4 }
  0xc1   :  { %v819_v11 = vsel %vm3586_vm0, 0.0, %v3584_v30  ;;  %v820_v46 = vsel %vm3589_vm1, 0.0, %v3587_v16  ;;  %vm3592_vm3 = vcmp.gt.f32.partialorder %v3591_v34, 0.1  ;;  %v790_v8 = vadd.s32 %v787_v9, %v786_v40  ;;  %907 = vst [vmem:[%s2935_s5 + $0x1a8] sm:$0xff] %v822_v27  ;;  %v3604_v50 = vld [vmem:[#allocation14_spill] sm:$0xff]  ;;  %vm3627_vm4 = vmmov %vm3586_vm0 }
  0xc2   :  { %v821_v15 = vsel %vm3592_vm3, 0.0, %v3590_v57  ;;  %904 = vst [vmem:[%s2935_s5 + $0x190] sm:$0xff] %v819_v11  ;;  %905 = vst [vmem:[%s2935_s5 + $0x198] sm:$0xff] %v820_v46  ;;  %v823_v52 = vsel %vm647_vm7, 0.0, %v3596_v21  ;;  %v791_v58 = vadd.s32 %v789_v32, %v788_v62  ;;  %v824_v51 = vsel %vm648_vm9, 0.0, %v3598_v48  ;;  %v3607_v54 = vld [vmem:[#allocation38_spill] sm:$0xff] }
  0xc3   :  { %906 = vst [vmem:[%s2935_s5 + $0x1a0] sm:$0xff] %v821_v15  ;;  %908 = vst [vmem:[%s2935_s5 + $0x1b0] sm:$0xff] %v823_v52  ;;  %vm3602_vm8 = vcmp.gt.f32.partialorder %v3601_v42, 0.1  ;;  %vm3605_vm2 = vcmp.gt.f32.partialorder %v3604_v50, 0.1  ;;  %v703_v12 = vadd.f32 %v702_v31, %v3606_v61 }
  0xc4   :  { %v825_v37 = vsel %vm3602_vm8, 0.0, %v3600_v13  ;;  %v826_v56 = vsel %vm3605_vm2, 0.0, %v3603_v41  ;;  %909 = vst [vmem:[%s2935_s5 + $0x1b8] sm:$0xff] %v824_v51  ;;  %v3608_v38 = vld [vmem:[#allocation78_spill] sm:$0xff]  ;;  %v3611_v55 = vld [vmem:[#allocation27_spill] sm:$0xff]  ;;  %v792_v25 = vadd.s32 %v791_v58, %v790_v8  ;;  %v3616_v53 = vld [vmem:[#allocation28_spill] sm:$0xff] }
  0xc5   :  { %910 = vst [vmem:[%s2935_s5 + $0x1c0] sm:$0xff] %v825_v37  ;;  %911 = vst [vmem:[%s2935_s5 + $0x1c8] sm:$0xff] %v826_v56  ;;  %vm3609_vm15 = vcmp.gt.f32.partialorder %v3608_v38, 0.1  ;;  %v3610_v2 = vld [vmem:[#allocation18_spill] sm:$0xff]  ;;  %v3615_v1 = vld [vmem:[#allocation39_spill] sm:$0xff]  ;;  %v704_v14 = vadd.f32 %v703_v12, %v3624_v47 }
  0xc6   :  { %v827_v44 = vsel %vm3609_vm15, 0.0, %v3607_v54  ;;  %vm3612_vm11 = vcmp.gt.f32.partialorder %v3611_v55, 0.1  ;;  %v3613_v23 = vld [vmem:[#allocation2_spill] sm:$0xff]  ;;  %vm3617_vm12 = vcmp.gt.f32.partialorder %v3616_v53, 0.1  ;;  %vm3628_vm0 = vmmov %vm3589_vm1 }
  0xc7   :  { %v828_v20 = vsel %vm3612_vm11, 0.0, %v3610_v2  ;;  %v829_v0 = vsel %vm653_vm13, 0.0, %v3613_v23  ;;  %912 = vst [vmem:[%s2935_s5 + $0x1d0] sm:$0xff] %v827_v44  ;;  %v830_v26 = vsel %vm3617_vm12, 0.0, %v3615_v1  ;;  %v3618_v33 = vld [vmem:[#allocation40_spill] sm:$0xff]  ;;  %v3621_v24 = vld [vmem:[#allocation41_spill] sm:$0xff]  ;;  %vm3629_vm1 = vmmov %vm3592_vm3 }
  0xc8   :  { %913 = vst [vmem:[%s2935_s5 + $0x1d8] sm:$0xff] %v828_v20  ;;  %914 = vst [vmem:[%s2935_s5 + $0x1e0] sm:$0xff] %v829_v0  ;;  %v3619_v60 = vld [vmem:[#allocation80_spill] sm:$0xff]  ;;  %v3622_v28 = vld [vmem:[#allocation29_spill] sm:$0xff]  ;;  %v675_v19 = vsel %vm3625_vm6, %v3579_v6, 0.0  ;;  %v793_v17 = vrot.slane %v792_v25, 4 }
  0xc9   :  { %vm3620_vm5 = vcmp.gt.f32.partialorder %v3619_v60, 0.1  ;;  %vm3623_vm14 = vcmp.gt.f32.partialorder %v3622_v28, 0.1  ;;  %915 = vst [vmem:[%s2935_s5 + $0x1e8] sm:$0xff] %v830_v26  ;;  %v3626_v45 = vld [vmem:[#allocation67_spill] sm:$0xff]  ;;  %vm3632_vm3 = vmmov %vm3609_vm15 }
  0xca   :  { %v831_v39 = vsel %vm3620_vm5, 0.0, %v3618_v33  ;;  %v832_v22 = vsel %vm3623_vm14, 0.0, %v3621_v24  ;;  %v705_v49 = vadd.f32 %v704_v14, %v3626_v45  ;;  %v676_v18 = vsel %vm3627_vm4, %v3584_v30, 0.0  ;;  %v729_v46 = vld [vmem:[%s2931_s9] sm:$0x1]  ;;  %vm3636_vm15 = vmmov %vm3623_vm14 }
  0xcb   :  { %916 = vst [vmem:[%s2935_s5 + $0x1f0] sm:$0xff] %v831_v39  ;;  %917 = vst [vmem:[%s2935_s5 + $0x1f8] sm:$0xff] %v832_v22  ;;  %v794_v10 = vadd.s32 %v793_v17, %v792_v25  ;;  %v677_v9 = vsel %vm3628_vm0, %v3587_v16, 0.0  ;;  %v678_v3 = vsel %vm3629_vm1, %v3590_v57, 0.0  ;;  %v679_v11 = vsel %vm646_vm10, %v3594_v29, 0.0 }
  0xcc   :  { %v706_v40 = vadd.f32 %v705_v49, %v675_v19  ;;  %v680_v16 = vsel %vm647_vm7, %v3596_v21, 0.0  ;;  %v681_v57 = vsel %vm648_vm9, %v3598_v48, 0.0  ;;  %vm3630_vm10 = vmmov %vm3602_vm8  ;;  %v684_v27 = vsel %vm3632_vm3, %v3607_v54, 0.0  ;;  %v657_v44 = vld [vmem:[%s2929_s7] sm:$0x1] }
  0xcd   :  { %v795_v62 = vrot.slane %v794_v10, 2  ;;  %v682_v31 = vsel %vm3630_vm10, %v3600_v13, 0.0  ;;  %vm3631_vm7 = vmmov %vm3605_vm2  ;;  %v686_v58 = vsel %vm653_vm13, %v3613_v23, 0.0  ;;  %v689_v37 = vsel %vm3636_vm15, %v3621_v24, 0.0 }
  0xce   :  { %v707_v59 = vadd.f32 %v706_v40, %v676_v18  ;;  %v683_v29 = vsel %vm3631_vm7, %v3603_v41, 0.0  ;;  %vm3633_vm9 = vmmov %vm3612_vm11 }
  0xcf   :  { %v796_v6 = vadd.s32 %v795_v62, %v794_v10  ;;  %v685_v36 = vsel %vm3633_vm9, %v3610_v2, 0.0  ;;  %vm3634_vm8 = vmmov %vm3617_vm12 }
  0xd0   :  { %v708_v32 = vadd.f32 %v707_v59, %v677_v9  ;;  %v687_v4 = vsel %vm3634_vm8, %v3615_v1, 0.0  ;;  %vm3635_vm2 = vmmov %vm3620_vm5 }
  0xd1   :  { %v797_v7 = vrot.slane %v796_v6, 1  ;;  %v688_v13 = vsel %vm3635_vm2, %v3618_v33, 0.0 }
  0xd2   :  { %v709_v30 = vadd.f32 %v708_v32, %v678_v3 }
  0xd3   :  { %v798_v43 = vadd.s32 %v797_v7, %v796_v6 }
  0xd4   :  { %v710_v15 = vadd.f32 %v709_v30, %v679_v11 }
  0xd5   :  { %v799_v34 = vadd.s32 %v798_v43, %v729_v46 }
  0xd6   :  { %v711_v5 = vadd.f32 %v710_v15, %v680_v16 }
  0xd7   :  { %800 = vst [vmem:[%s2931_s9] sm:$0x1] %v799_v34 }
  0xd8   :  { %v712_v8 = vadd.f32 %v711_v5, %v681_v57 }
  0xda   :  { %v713_v35 = vadd.f32 %v712_v8, %v682_v31 }
  0xdc   :  { %v714_v21 = vadd.f32 %v713_v35, %v683_v29 }
  0xde   :  { %v715_v52 = vadd.f32 %v714_v21, %v684_v27 }
  0xe0   :  { %v716_v48 = vadd.f32 %v715_v52, %v685_v36 }
  0xe2   :  { %v717_v51 = vadd.f32 %v716_v48, %v686_v58 }
  0xe4   :  { %v718_v42 = vadd.f32 %v717_v51, %v687_v4 }
  0xe6   :  { %v719_v41 = vadd.f32 %v718_v42, %v688_v13 }
  0xe8   :  { %v720_v50 = vadd.f32 %v719_v41, %v689_v37 }
  0xea   :  { %v721_v56 = vrot.slane %v720_v50, 4 }
  0xec   :  { %v722_v61 = vadd.f32 %v721_v56, %v720_v50 }
  0xee   :  { %v723_v12 = vrot.slane %v722_v61, 2 }
  0xf0   :  { %v724_v54 = vadd.f32 %v723_v12, %v722_v61 }
  0xf2   :  { %v725_v38 = vrot.slane %v724_v54, 1 }
  0xf4   :  { %v726_v2 = vadd.f32 %v725_v38, %v724_v54 }
  0xf6   :  { %v727_v55 = vadd.f32 %v726_v2, %v657_v44 }
  0xf8   :  { %728 = vst [vmem:[%s2929_s7] sm:$0x1] %v727_v55 }

</bundles_post_ra>
